<compile_context>
chip_gen: v7x
topology: tpu7x:2x2x1
jax: 0.10.0
libtpu: 0.0.40
codegen_flags: <defaults>
</compile_context>

<pallas_src>
import functools

import jax
import jax.numpy as jnp
from jax.experimental import pallas as pl
from jax.experimental.pallas import tpu as pltpu

C = 128        # lane-padded channel width for all internal activations / weights
MAX_BB = 8     # max batch elements folded into one grid step


# -----------------------------------------------------------------------------
# Fused kernel: backbone + predictor, one grid step per batch block
# -----------------------------------------------------------------------------
def _make_fused_kernel(Bb, Ho2, Wo2):
    """Build the fused backbone+predictor kernel.

    Ho2 x Wo2 is the final feature-map resolution (crop_size / 4).  All spatial
    maps are kept flattened as (Bb, S, C) values with S = Ho2*Wo2 so that tap
    extraction uses only contiguous slices, concatenations and lane masks.
    """
    S = Ho2 * Wo2
    inv_s = 1.0 / float(S)
    pow2 = (Wo2 & (Wo2 - 1)) == 0

    def spatial_shift(p, dr, dc):
        """Q[r, c] = p[r + dr, c + dc] (zero outside) on a (Bb, S, C) flat map."""
        n, _, c = p.shape
        zrows = lambda k: jnp.zeros((n, k, c), p.dtype)
        if dr > 0:
            k = Wo2 * dr
            p = jnp.concatenate([p[:, k:, :], zrows(k)], axis=1)
        elif dr < 0:
            k = Wo2 * (-dr)
            p = jnp.concatenate([zrows(k), p[:, :S - k, :]], axis=1)
        if dc != 0:
            k = abs(dc)
            if dc > 0:
                p = jnp.concatenate([p[:, k:, :], zrows(k)], axis=1)
            else:
                p = jnp.concatenate([zrows(k), p[:, :S - k, :]], axis=1)
            s_idx = jax.lax.broadcasted_iota(jnp.int32, p.shape, 1)
            col = (s_idx & (Wo2 - 1)) if pow2 else (s_idx % Wo2)
            keep = (col < (Wo2 - dc)) if dc > 0 else (col >= k)
            p = jnp.where(keep, p, jnp.zeros_like(p))
        return p

    def conv_matmul(taps, w_ref, b_ref):
        """One MXU matmul per conv layer: (Bb*S, 9*C) x (9*C, C) + bias."""
        lhs = jnp.concatenate(taps, axis=-1).reshape(Bb * S, 9 * C)
        return jnp.dot(lhs, w_ref[...],
                       preferred_element_type=jnp.float32) + b_ref[...]

    def kernel(xcols, w1, b1, w2, b2, wa, ba, wb, bb, wfc, bfc, o_ref):
        f32, bf16 = jnp.float32, jnp.bfloat16

        # ---- conv1 (3x3 / stride 2): im2col'd at the JAX boundary, so it is a
        #      single dense (Bb*4*S, 128) x (128, 128) matmul (27 real K lanes).
        lhs1 = xcols[...].reshape(Bb * 4 * S, C)
        y1 = jnp.dot(lhs1, w1[...], preferred_element_type=f32) + b1[...]
        y1 = jnp.maximum(y1, 0.0).astype(bf16).reshape(Bb, 4, S, C)

        # conv1 output arrives pre-arranged as 4 space-to-depth parity planes:
        # plane p = rp*2 + cp holds conv1_out[2r+rp, 2c+cp] at flat index r*Wo2+c.
        planes = [y1[:, p] for p in range(4)]                 # each (Bb, S, C)

        # ---- conv2 (3x3 / stride 2): each tap is one parity plane, shifted by
        #      at most one row/col with zero fill -> contiguous ops only.
        taps2 = []
        for kh in range(3):
            rp, dr = (0, 0) if kh == 1 else (1, -1 if kh == 0 else 0)
            for kw in range(3):
                cp, dc = (0, 0) if kw == 1 else (1, -1 if kw == 0 else 0)
                taps2.append(spatial_shift(planes[rp * 2 + cp], dr, dc))
        o2 = jnp.maximum(conv_matmul(taps2, w2, b2), 0.0)     # (Bb*S, C) f32
        o2b = o2.astype(bf16).reshape(Bb, S, C)

        # ---- residual block: two 3x3 / stride-1 convs + identity skip (conv2 out).
        def taps_s1(act):
            return [spatial_shift(act, kh - 1, kw - 1)
                    for kh in range(3) for kw in range(3)]

        oa = jnp.maximum(conv_matmul(taps_s1(o2b), wa, ba), 0.0)
        ob = jnp.maximum(
            conv_matmul(taps_s1(oa.astype(bf16).reshape(Bb, S, C)), wb, bb) + o2,
            0.0)                                              # (Bb*S, C) f32

        # ---- predictor (AdapAvgPoolPredictor): global avg-pool -> FC.
        pooled = jnp.sum(ob.reshape(Bb, S, C), axis=1) * inv_s      # (Bb, C) f32
        out = jnp.dot(pooled.astype(bf16), wfc[...],
                      preferred_element_type=f32) + bfc[...]
        o_ref[...] = out

    return kernel


# -----------------------------------------------------------------------------
# Boundary-only layout work: conv1 im2col in space-to-depth (parity-plane) order
# -----------------------------------------------------------------------------
def _conv1_space_to_depth_im2col(x_nchw):
    """(B, cin, H, W) -> (B, 4, S, 128) bf16 conv1 patches.

    dim1: parity plane p = rp*2 + cp of the conv1 output grid
    dim2: s = r*Wo2 + c within the plane (conv1 output position (2r+rp, 2c+cp))
    dim3: the 9*cin tap values of that 3x3/stride-2 patch, zero-padded to 128.
    The source is only H*W*cin elements, so this is cheap and cuts the kernel's
    input DMA vs. shipping a 128-lane padded image.
    """
    B, cin, H, W = x_nchw.shape
    Ho1, Wo1 = H // 2, W // 2
    Ho2, Wo2 = Ho1 // 2, Wo1 // 2
    x = jnp.transpose(x_nchw, (0, 2, 3, 1)).astype(jnp.float32)
    xp = jnp.pad(x, ((0, 0), (1, 1), (1, 1), (0, 0)))
    taps = [xp[:, kh:kh + 2 * Ho1:2, kw:kw + 2 * Wo1:2, :]
            for kh in range(3) for kw in range(3)]
    cols = jnp.stack(taps, axis=3).reshape(B, Ho1, Wo1, 9 * cin)
    cols = cols.reshape(B, Ho2, 2, Wo2, 2, 9 * cin)
    cols = jnp.transpose(cols, (0, 2, 4, 1, 3, 5))            # (B, rp, cp, r, c, .)
    cols = cols.reshape(B, 4, Ho2 * Wo2, 9 * cin)
    cols = jnp.pad(cols, ((0, 0), (0, 0), (0, 0), (0, C - 9 * cin)))
    return cols.astype(jnp.bfloat16)


# -----------------------------------------------------------------------------
# Forward wrapper
# -----------------------------------------------------------------------------
def model_builder_forward(params, x_nchw, num_kpts=5):
    """ModelBuilder.forward: x -> backbone(x) -> predictor(x) -> (B, num_kpts, 2)."""
    B, cin, H, W = x_nchw.shape
    assert H % 4 == 0 and W % 4 == 0, "backbone downsample_ratio is 4"
    Ho2, Wo2 = H // 4, W // 4
    S = Ho2 * Wo2

    xcols = _conv1_space_to_depth_im2col(x_nchw)              # (B, 4, S, 128) bf16

    Bb = B if B < MAX_BB else MAX_BB
    Bpad = ((B + Bb - 1) // Bb) * Bb
    if Bpad != B:
        xcols = jnp.pad(xcols, ((0, Bpad - B), (0, 0), (0, 0), (0, 0)))

    kernel = _make_fused_kernel(Bb, Ho2, Wo2)
    w9_spec = pl.BlockSpec((9 * C, C), lambda i: (0, 0))
    w1_spec = pl.BlockSpec((C, C), lambda i: (0, 0))
    b_spec = pl.BlockSpec((1, C), lambda i: (0, 0))
    # TODO(synk): constant-index weight inputs could be single-buffered
    # (pipeline_mode=pl.Buffered(1)); kept at the default for simplicity.

    out = pl.pallas_call(
        kernel,
        out_shape=jax.ShapeDtypeStruct((Bpad, C), jnp.float32),
        grid=(Bpad // Bb,),
        in_specs=[
            pl.BlockSpec((Bb, 4, S, C), lambda i: (i, 0, 0, 0)),  # conv1 patches
            w1_spec, b_spec,                                      # conv1
            w9_spec, b_spec,                                      # conv2
            w9_spec, b_spec,                                      # block_a
            w9_spec, b_spec,                                      # block_b
            w1_spec, b_spec,                                      # predictor FC
        ],
        out_specs=pl.BlockSpec((Bb, C), lambda i: (i, 0)),
        compiler_params=pltpu.CompilerParams(
            dimension_semantics=("parallel",)),     # batch shards across TCs on v7x
    )(xcols, params["w1"], params["b1"], params["w2"], params["b2"],
      params["wa"], params["ba"], params["wb"], params["bb"],
      params["wfc"], params["bfc"])

    return out[:B, :num_kpts * 2].reshape(B, num_kpts, 2)


# -----------------------------------------------------------------------------
# Parameters: PyTorch-style init, then one-time packing into kernel layout
# -----------------------------------------------------------------------------
def init_params(key, cin=3, num_kpts=5):
    """Deterministic synthetic params in PyTorch layouts (OIHW conv, (O, I) FC)."""
    ks = jax.random.split(key, 6)

    def conv_p(k, ci, co):
        kw_, kb_ = jax.random.split(k)
        w = jax.random.normal(kw_, (co, ci, 3, 3), jnp.float32) * (2.0 / (ci * 9)) ** 0.5
        b = jax.random.normal(kb_, (co,), jnp.float32) * 0.01
        return w, b

    p = {}
    p["conv1"] = conv_p(ks[0], cin, 16)                 # stride 2
    p["conv2"] = conv_p(ks[1], 16, 32)                  # stride 2
    p["block_a"] = conv_p(ks[2], 32, 32)                # residual block conv a
    p["block_b"] = conv_p(ks[3], 32, 32)                # residual block conv b
    p["fc_w"] = jax.random.normal(ks[4], (num_kpts * 2, 32), jnp.float32) * (1.0 / 32) ** 0.5
    p["fc_b"] = jax.random.normal(ks[5], (num_kpts * 2,), jnp.float32) * 0.01
    return p


def prepare_params(p):
    """Pack params into the kernel's layouts (once, off the hot path)."""
    def prep_conv_dense(w, b):
        # conv1: taps packed densely (row = tap*cin + ci, 27 real rows) -> (128, 128)
        co, ci = w.shape[0], w.shape[1]
        wp = jnp.transpose(w, (2, 3, 1, 0)).reshape(9 * ci, co)
        wp = jnp.pad(wp, ((0, C - 9 * ci), (0, C - co))).astype(jnp.bfloat16)
        bp = jnp.pad(b, (0, C - co)).reshape(1, C).astype(jnp.float32)
        return wp, bp

    def prep_conv(w, b):
        # lane-padded per-tap packing: row = tap*128 + ci -> (9*128, 128)
        co, ci = w.shape[0], w.shape[1]
        wp = jnp.transpose(w, (2, 3, 1, 0))
        wp = jnp.pad(wp, ((0, 0), (0, 0), (0, C - ci), (0, C - co)))
        wp = wp.reshape(9 * C, C).astype(jnp.bfloat16)
        bp = jnp.pad(b, (0, C - co)).reshape(1, C).astype(jnp.float32)
        return wp, bp

    q = {}
    q["w1"], q["b1"] = prep_conv_dense(*p["conv1"])
    q["w2"], q["b2"] = prep_conv(*p["conv2"])
    q["wa"], q["ba"] = prep_conv(*p["block_a"])
    q["wb"], q["bb"] = prep_conv(*p["block_b"])
    O, I = p["fc_w"].shape
    q["wfc"] = jnp.pad(p["fc_w"].T, ((0, C - I), (0, C - O))).astype(jnp.bfloat16)
    q["bfc"] = jnp.pad(p["fc_b"], (0, C - O)).reshape(1, C).astype(jnp.float32)
    return q


# -----------------------------------------------------------------------------
# Pure-JAX reference of the same stand-in network (for a tolerance check)
# -----------------------------------------------------------------------------
def _reference_forward(p, x_nchw, num_kpts):
    dn = ("NCHW", "OIHW", "NCHW")

    def conv(x, wb_pair, stride):
        w, b = wb_pair
        y = jax.lax.conv_general_dilated(x, w, (stride, stride),
                                         ((1, 1), (1, 1)), dimension_numbers=dn)
        return y + b.reshape(1, -1, 1, 1)

    h = jax.nn.relu(conv(x_nchw, p["conv1"], 2))
    h = jax.nn.relu(conv(h, p["conv2"], 2))
    a = jax.nn.relu(conv(h, p["block_a"], 1))
    o = jax.nn.relu(conv(a, p["block_b"], 1) + h)
    pooled = jnp.mean(o, axis=(2, 3))
    out = pooled @ p["fc_w"].T + p["fc_b"]
    return out.reshape(x_nchw.shape[0], num_kpts, 2)


if __name__ == "__main__":
    key = jax.random.PRNGKey(0)
    kp, kx = jax.random.split(key)

    num_kpts = 5
    raw_params = init_params(kp, cin=3, num_kpts=num_kpts)
    params = prepare_params(raw_params)
    x = jax.random.normal(kx, (2, 3, 16, 16), jnp.float32)   # NCHW, crop_size = 16

    fwd = jax.jit(functools.partial(model_builder_forward, num_kpts=num_kpts))
    y = fwd(params, x)
    jax.block_until_ready(y)

    assert y.shape == (2, num_kpts, 2), y.shape
    assert bool(jnp.all(jnp.isfinite(y)))
    y_ref = _reference_forward(raw_params, x, num_kpts)
    assert bool(jnp.all(jnp.abs(y - y_ref) < 0.1)), float(jnp.max(jnp.abs(y - y_ref)))
    print("KERNEL_OK")
</pallas_src>

<mosaic_0001>
module attributes {stable_mosaic.version = 11 : i64} {
  func.func @kernel(%arg0: i32, %arg1: memref<2x4x16x128xbf16, #tpu.memory_space<vmem>>, %arg2: memref<128x128xbf16, #tpu.memory_space<vmem>>, %arg3: memref<1x128xf32, #tpu.memory_space<vmem>>, %arg4: memref<1152x128xbf16, #tpu.memory_space<vmem>>, %arg5: memref<1x128xf32, #tpu.memory_space<vmem>>, %arg6: memref<1152x128xbf16, #tpu.memory_space<vmem>>, %arg7: memref<1x128xf32, #tpu.memory_space<vmem>>, %arg8: memref<1152x128xbf16, #tpu.memory_space<vmem>>, %arg9: memref<1x128xf32, #tpu.memory_space<vmem>>, %arg10: memref<128x128xbf16, #tpu.memory_space<vmem>>, %arg11: memref<1x128xf32, #tpu.memory_space<vmem>>, %arg12: memref<2x128xf32, #tpu.memory_space<vmem>>) attributes {dimension_semantics = [#tpu.dimension_semantics<parallel>], iteration_bounds = array<i64: 1>, scalar_prefetch = 0 : i64, scratch_operands = 0 : i64, tpu.core_type = #tpu.core_type<tc>, window_params = [{transform_indices = @transform_0, window_bounds = array<i64: 2, 4, 16, 128>}, {pipeline_mode = #tpu.pipeline_mode<synchronous>, transform_indices = @transform_1, window_bounds = array<i64: 128, 128>}, {pipeline_mode = #tpu.pipeline_mode<synchronous>, transform_indices = @transform_2, window_bounds = array<i64: 1, 128>}, {pipeline_mode = #tpu.pipeline_mode<synchronous>, transform_indices = @transform_3, window_bounds = array<i64: 1152, 128>}, {pipeline_mode = #tpu.pipeline_mode<synchronous>, transform_indices = @transform_4, window_bounds = array<i64: 1, 128>}, {pipeline_mode = #tpu.pipeline_mode<synchronous>, transform_indices = @transform_5, window_bounds = array<i64: 1152, 128>}, {pipeline_mode = #tpu.pipeline_mode<synchronous>, transform_indices = @transform_6, window_bounds = array<i64: 1, 128>}, {pipeline_mode = #tpu.pipeline_mode<synchronous>, transform_indices = @transform_7, window_bounds = array<i64: 1152, 128>}, {pipeline_mode = #tpu.pipeline_mode<synchronous>, transform_indices = @transform_8, window_bounds = array<i64: 1, 128>}, {pipeline_mode = #tpu.pipeline_mode<synchronous>, transform_indices = @transform_9, window_bounds = array<i64: 128, 128>}, {pipeline_mode = #tpu.pipeline_mode<synchronous>, transform_indices = @transform_10, window_bounds = array<i64: 1, 128>}, {transform_indices = @transform_11, window_bounds = array<i64: 2, 128>}]} {
    %c0 = arith.constant 0 : index
    %c0_0 = arith.constant 0 : index
    %c0_1 = arith.constant 0 : index
    %c0_2 = arith.constant 0 : index
    %0 = vector.load %arg1[%c0, %c0_0, %c0_1, %c0_2] : memref<2x4x16x128xbf16, #tpu.memory_space<vmem>>, vector<2x4x16x128xbf16>
    %1 = vector.shape_cast %0 : vector<2x4x16x128xbf16> to vector<128x128xbf16>
    %c0_3 = arith.constant 0 : index
    %c0_4 = arith.constant 0 : index
    %2 = vector.load %arg2[%c0_3, %c0_4] : memref<128x128xbf16, #tpu.memory_space<vmem>>, vector<128x128xbf16>
    %cst = arith.constant dense<0.000000e+00> : vector<128x128xf32>
    %3 = tpu.matmul %1, %2, %cst {dimension_numbers = #tpu.dot_dimension_numbers<[1], [0], [0], [1], [0, 0, 1, 1], [], []>} : vector<128x128xbf16>, vector<128x128xbf16>, vector<128x128xf32> -> vector<128x128xf32>
    %c0_5 = arith.constant 0 : index
    %c0_6 = arith.constant 0 : index
    %4 = vector.load %arg3[%c0_5, %c0_6] : memref<1x128xf32, #tpu.memory_space<vmem>>, vector<1x128xf32>
    %5 = vector.broadcast %4 : vector<1x128xf32> to vector<128x128xf32>
    %6 = arith.addf %3, %5 : vector<128x128xf32>
    %cst_7 = arith.constant 0.000000e+00 : f32
    %7 = vector.broadcast %cst_7 : f32 to vector<128x128xf32>
    %8 = arith.maximumf %6, %7 : vector<128x128xf32>
    %9 = arith.truncf %8 : vector<128x128xf32> to vector<128x128xbf16>
    %10 = vector.shape_cast %9 : vector<128x128xbf16> to vector<2x4x16x128xbf16>
    %11 = vector.extract_strided_slice %10 {offsets = [0, 0, 0, 0], sizes = [2, 1, 16, 128], strides = [1, 1, 1, 1]} : vector<2x4x16x128xbf16> to vector<2x1x16x128xbf16>
    %12 = vector.shape_cast %11 : vector<2x1x16x128xbf16> to vector<2x16x128xbf16>
    %13 = vector.extract_strided_slice %10 {offsets = [0, 1, 0, 0], sizes = [2, 1, 16, 128], strides = [1, 1, 1, 1]} : vector<2x4x16x128xbf16> to vector<2x1x16x128xbf16>
    %14 = vector.shape_cast %13 : vector<2x1x16x128xbf16> to vector<2x16x128xbf16>
    %15 = vector.extract_strided_slice %10 {offsets = [0, 2, 0, 0], sizes = [2, 1, 16, 128], strides = [1, 1, 1, 1]} : vector<2x4x16x128xbf16> to vector<2x1x16x128xbf16>
    %16 = vector.shape_cast %15 : vector<2x1x16x128xbf16> to vector<2x16x128xbf16>
    %17 = vector.extract_strided_slice %10 {offsets = [0, 3, 0, 0], sizes = [2, 1, 16, 128], strides = [1, 1, 1, 1]} : vector<2x4x16x128xbf16> to vector<2x1x16x128xbf16>
    %18 = vector.shape_cast %17 : vector<2x1x16x128xbf16> to vector<2x16x128xbf16>
    %cst_8 = arith.constant 0.000000e+00 : bf16
    %19 = vector.broadcast %cst_8 : bf16 to vector<2x4x128xbf16>
    %20 = vector.extract_strided_slice %18 {offsets = [0, 0, 0], sizes = [2, 12, 128], strides = [1, 1, 1]} : vector<2x16x128xbf16> to vector<2x12x128xbf16>
    %21 = tpu.concatenate %19, %20 in 1 : vector<2x4x128xbf16>, vector<2x12x128xbf16> -> vector<2x16x128xbf16>
    %cst_9 = arith.constant 0.000000e+00 : bf16
    %22 = vector.broadcast %cst_9 : bf16 to vector<2x1x128xbf16>
    %23 = vector.extract_strided_slice %21 {offsets = [0, 0, 0], sizes = [2, 15, 128], strides = [1, 1, 1]} : vector<2x16x128xbf16> to vector<2x15x128xbf16>
    %24 = tpu.concatenate %22, %23 in 1 : vector<2x1x128xbf16>, vector<2x15x128xbf16> -> vector<2x16x128xbf16>
    %25 = tpu.iota {dimensions = array<i32: 1>} : vector<2x16x128xi32>
    %c3_i32 = arith.constant 3 : i32
    %26 = vector.broadcast %c3_i32 : i32 to vector<2x16x128xi32>
    %27 = arith.andi %25, %26 : vector<2x16x128xi32>
    %c1_i32 = arith.constant 1 : i32
    %28 = vector.broadcast %c1_i32 : i32 to vector<2x16x128xi32>
    %29 = arith.cmpi sge, %27, %28 : vector<2x16x128xi32>
    %cst_10 = arith.constant 0.000000e+00 : bf16
    %30 = vector.broadcast %cst_10 : bf16 to vector<2x16x128xbf16>
    %31 = arith.select %29, %24, %30 : vector<2x16x128xi1>, vector<2x16x128xbf16>
    %cst_11 = arith.constant 0.000000e+00 : bf16
    %32 = vector.broadcast %cst_11 : bf16 to vector<2x4x128xbf16>
    %33 = vector.extract_strided_slice %16 {offsets = [0, 0, 0], sizes = [2, 12, 128], strides = [1, 1, 1]} : vector<2x16x128xbf16> to vector<2x12x128xbf16>
    %34 = tpu.concatenate %32, %33 in 1 : vector<2x4x128xbf16>, vector<2x12x128xbf16> -> vector<2x16x128xbf16>
    %cst_12 = arith.constant 0.000000e+00 : bf16
    %35 = vector.broadcast %cst_12 : bf16 to vector<2x4x128xbf16>
    %36 = vector.extract_strided_slice %18 {offsets = [0, 0, 0], sizes = [2, 12, 128], strides = [1, 1, 1]} : vector<2x16x128xbf16> to vector<2x12x128xbf16>
    %37 = tpu.concatenate %35, %36 in 1 : vector<2x4x128xbf16>, vector<2x12x128xbf16> -> vector<2x16x128xbf16>
    %cst_13 = arith.constant 0.000000e+00 : bf16
    %38 = vector.broadcast %cst_13 : bf16 to vector<2x1x128xbf16>
    %39 = vector.extract_strided_slice %14 {offsets = [0, 0, 0], sizes = [2, 15, 128], strides = [1, 1, 1]} : vector<2x16x128xbf16> to vector<2x15x128xbf16>
    %40 = tpu.concatenate %38, %39 in 1 : vector<2x1x128xbf16>, vector<2x15x128xbf16> -> vector<2x16x128xbf16>
    %41 = tpu.iota {dimensions = array<i32: 1>} : vector<2x16x128xi32>
    %c3_i32_14 = arith.constant 3 : i32
    %42 = vector.broadcast %c3_i32_14 : i32 to vector<2x16x128xi32>
    %43 = arith.andi %41, %42 : vector<2x16x128xi32>
    %c1_i32_15 = arith.constant 1 : i32
    %44 = vector.broadcast %c1_i32_15 : i32 to vector<2x16x128xi32>
    %45 = arith.cmpi sge, %43, %44 : vector<2x16x128xi32>
    %cst_16 = arith.constant 0.000000e+00 : bf16
    %46 = vector.broadcast %cst_16 : bf16 to vector<2x16x128xbf16>
    %47 = arith.select %45, %40, %46 : vector<2x16x128xi1>, vector<2x16x128xbf16>
    %cst_17 = arith.constant 0.000000e+00 : bf16
    %48 = vector.broadcast %cst_17 : bf16 to vector<2x1x128xbf16>
    %49 = vector.extract_strided_slice %18 {offsets = [0, 0, 0], sizes = [2, 15, 128], strides = [1, 1, 1]} : vector<2x16x128xbf16> to vector<2x15x128xbf16>
    %50 = tpu.concatenate %48, %49 in 1 : vector<2x1x128xbf16>, vector<2x15x128xbf16> -> vector<2x16x128xbf16>
    %51 = tpu.iota {dimensions = array<i32: 1>} : vector<2x16x128xi32>
    %c3_i32_18 = arith.constant 3 : i32
    %52 = vector.broadcast %c3_i32_18 : i32 to vector<2x16x128xi32>
    %53 = arith.andi %51, %52 : vector<2x16x128xi32>
    %c1_i32_19 = arith.constant 1 : i32
    %54 = vector.broadcast %c1_i32_19 : i32 to vector<2x16x128xi32>
    %55 = arith.cmpi sge, %53, %54 : vector<2x16x128xi32>
    %cst_20 = arith.constant 0.000000e+00 : bf16
    %56 = vector.broadcast %cst_20 : bf16 to vector<2x16x128xbf16>
    %57 = arith.select %55, %50, %56 : vector<2x16x128xi1>, vector<2x16x128xbf16>
    %58 = tpu.concatenate %31, %34, %37, %47, %12, %14, %57, %16, %18 in 2 : vector<2x16x128xbf16>, vector<2x16x128xbf16>, vector<2x16x128xbf16>, vector<2x16x128xbf16>, vector<2x16x128xbf16>, vector<2x16x128xbf16>, vector<2x16x128xbf16>, vector<2x16x128xbf16>, vector<2x16x128xbf16> -> vector<2x16x1152xbf16>
    %59 = vector.shape_cast %58 : vector<2x16x1152xbf16> to vector<32x1152xbf16>
    %c0_21 = arith.constant 0 : index
    %c0_22 = arith.constant 0 : index
    %60 = vector.load %arg4[%c0_21, %c0_22] : memref<1152x128xbf16, #tpu.memory_space<vmem>>, vector<1152x128xbf16>
    %cst_23 = arith.constant dense<0.000000e+00> : vector<32x128xf32>
    %61 = tpu.matmul %59, %60, %cst_23 {dimension_numbers = #tpu.dot_dimension_numbers<[1], [0], [0], [1], [0, 0, 1, 1], [], []>} : vector<32x1152xbf16>, vector<1152x128xbf16>, vector<32x128xf32> -> vector<32x128xf32>
    %c0_24 = arith.constant 0 : index
    %c0_25 = arith.constant 0 : index
    %62 = vector.load %arg5[%c0_24, %c0_25] : memref<1x128xf32, #tpu.memory_space<vmem>>, vector<1x128xf32>
    %63 = vector.broadcast %62 : vector<1x128xf32> to vector<32x128xf32>
    %64 = arith.addf %61, %63 : vector<32x128xf32>
    %cst_26 = arith.constant 0.000000e+00 : f32
    %65 = vector.broadcast %cst_26 : f32 to vector<32x128xf32>
    %66 = arith.maximumf %64, %65 : vector<32x128xf32>
    %67 = arith.truncf %66 : vector<32x128xf32> to vector<32x128xbf16>
    %68 = vector.shape_cast %67 : vector<32x128xbf16> to vector<2x16x128xbf16>
    %cst_27 = arith.constant 0.000000e+00 : bf16
    %69 = vector.broadcast %cst_27 : bf16 to vector<2x4x128xbf16>
    %70 = vector.extract_strided_slice %68 {offsets = [0, 0, 0], sizes = [2, 12, 128], strides = [1, 1, 1]} : vector<2x16x128xbf16> to vector<2x12x128xbf16>
    %71 = tpu.concatenate %69, %70 in 1 : vector<2x4x128xbf16>, vector<2x12x128xbf16> -> vector<2x16x128xbf16>
    %cst_28 = arith.constant 0.000000e+00 : bf16
    %72 = vector.broadcast %cst_28 : bf16 to vector<2x1x128xbf16>
    %73 = vector.extract_strided_slice %71 {offsets = [0, 0, 0], sizes = [2, 15, 128], strides = [1, 1, 1]} : vector<2x16x128xbf16> to vector<2x15x128xbf16>
    %74 = tpu.concatenate %72, %73 in 1 : vector<2x1x128xbf16>, vector<2x15x128xbf16> -> vector<2x16x128xbf16>
    %75 = tpu.iota {dimensions = array<i32: 1>} : vector<2x16x128xi32>
    %c3_i32_29 = arith.constant 3 : i32
    %76 = vector.broadcast %c3_i32_29 : i32 to vector<2x16x128xi32>
    %77 = arith.andi %75, %76 : vector<2x16x128xi32>
    %c1_i32_30 = arith.constant 1 : i32
    %78 = vector.broadcast %c1_i32_30 : i32 to vector<2x16x128xi32>
    %79 = arith.cmpi sge, %77, %78 : vector<2x16x128xi32>
    %cst_31 = arith.constant 0.000000e+00 : bf16
    %80 = vector.broadcast %cst_31 : bf16 to vector<2x16x128xbf16>
    %81 = arith.select %79, %74, %80 : vector<2x16x128xi1>, vector<2x16x128xbf16>
    %cst_32 = arith.constant 0.000000e+00 : bf16
    %82 = vector.broadcast %cst_32 : bf16 to vector<2x4x128xbf16>
    %83 = vector.extract_strided_slice %68 {offsets = [0, 0, 0], sizes = [2, 12, 128], strides = [1, 1, 1]} : vector<2x16x128xbf16> to vector<2x12x128xbf16>
    %84 = tpu.concatenate %82, %83 in 1 : vector<2x4x128xbf16>, vector<2x12x128xbf16> -> vector<2x16x128xbf16>
    %cst_33 = arith.constant 0.000000e+00 : bf16
    %85 = vector.broadcast %cst_33 : bf16 to vector<2x4x128xbf16>
    %86 = vector.extract_strided_slice %68 {offsets = [0, 0, 0], sizes = [2, 12, 128], strides = [1, 1, 1]} : vector<2x16x128xbf16> to vector<2x12x128xbf16>
    %87 = tpu.concatenate %85, %86 in 1 : vector<2x4x128xbf16>, vector<2x12x128xbf16> -> vector<2x16x128xbf16>
    %88 = vector.extract_strided_slice %87 {offsets = [0, 1, 0], sizes = [2, 15, 128], strides = [1, 1, 1]} : vector<2x16x128xbf16> to vector<2x15x128xbf16>
    %cst_34 = arith.constant 0.000000e+00 : bf16
    %89 = vector.broadcast %cst_34 : bf16 to vector<2x1x128xbf16>
    %90 = tpu.concatenate %88, %89 in 1 : vector<2x15x128xbf16>, vector<2x1x128xbf16> -> vector<2x16x128xbf16>
    %91 = tpu.iota {dimensions = array<i32: 1>} : vector<2x16x128xi32>
    %c3_i32_35 = arith.constant 3 : i32
    %92 = vector.broadcast %c3_i32_35 : i32 to vector<2x16x128xi32>
    %93 = arith.andi %91, %92 : vector<2x16x128xi32>
    %c3_i32_36 = arith.constant 3 : i32
    %94 = vector.broadcast %c3_i32_36 : i32 to vector<2x16x128xi32>
    %95 = arith.cmpi slt, %93, %94 : vector<2x16x128xi32>
    %cst_37 = arith.constant 0.000000e+00 : bf16
    %96 = vector.broadcast %cst_37 : bf16 to vector<2x16x128xbf16>
    %97 = arith.select %95, %90, %96 : vector<2x16x128xi1>, vector<2x16x128xbf16>
    %cst_38 = arith.constant 0.000000e+00 : bf16
    %98 = vector.broadcast %cst_38 : bf16 to vector<2x1x128xbf16>
    %99 = vector.extract_strided_slice %68 {offsets = [0, 0, 0], sizes = [2, 15, 128], strides = [1, 1, 1]} : vector<2x16x128xbf16> to vector<2x15x128xbf16>
    %100 = tpu.concatenate %98, %99 in 1 : vector<2x1x128xbf16>, vector<2x15x128xbf16> -> vector<2x16x128xbf16>
    %101 = tpu.iota {dimensions = array<i32: 1>} : vector<2x16x128xi32>
    %c3_i32_39 = arith.constant 3 : i32
    %102 = vector.broadcast %c3_i32_39 : i32 to vector<2x16x128xi32>
    %103 = arith.andi %101, %102 : vector<2x16x128xi32>
    %c1_i32_40 = arith.constant 1 : i32
    %104 = vector.broadcast %c1_i32_40 : i32 to vector<2x16x128xi32>
    %105 = arith.cmpi sge, %103, %104 : vector<2x16x128xi32>
    %cst_41 = arith.constant 0.000000e+00 : bf16
    %106 = vector.broadcast %cst_41 : bf16 to vector<2x16x128xbf16>
    %107 = arith.select %105, %100, %106 : vector<2x16x128xi1>, vector<2x16x128xbf16>
    %108 = vector.extract_strided_slice %68 {offsets = [0, 1, 0], sizes = [2, 15, 128], strides = [1, 1, 1]} : vector<2x16x128xbf16> to vector<2x15x128xbf16>
    %cst_42 = arith.constant 0.000000e+00 : bf16
    %109 = vector.broadcast %cst_42 : bf16 to vector<2x1x128xbf16>
    %110 = tpu.concatenate %108, %109 in 1 : vector<2x15x128xbf16>, vector<2x1x128xbf16> -> vector<2x16x128xbf16>
    %111 = tpu.iota {dimensions = array<i32: 1>} : vector<2x16x128xi32>
    %c3_i32_43 = arith.constant 3 : i32
    %112 = vector.broadcast %c3_i32_43 : i32 to vector<2x16x128xi32>
    %113 = arith.andi %111, %112 : vector<2x16x128xi32>
    %c3_i32_44 = arith.constant 3 : i32
    %114 = vector.broadcast %c3_i32_44 : i32 to vector<2x16x128xi32>
    %115 = arith.cmpi slt, %113, %114 : vector<2x16x128xi32>
    %cst_45 = arith.constant 0.000000e+00 : bf16
    %116 = vector.broadcast %cst_45 : bf16 to vector<2x16x128xbf16>
    %117 = arith.select %115, %110, %116 : vector<2x16x128xi1>, vector<2x16x128xbf16>
    %118 = vector.extract_strided_slice %68 {offsets = [0, 4, 0], sizes = [2, 12, 128], strides = [1, 1, 1]} : vector<2x16x128xbf16> to vector<2x12x128xbf16>
    %cst_46 = arith.constant 0.000000e+00 : bf16
    %119 = vector.broadcast %cst_46 : bf16 to vector<2x4x128xbf16>
    %120 = tpu.concatenate %118, %119 in 1 : vector<2x12x128xbf16>, vector<2x4x128xbf16> -> vector<2x16x128xbf16>
    %cst_47 = arith.constant 0.000000e+00 : bf16
    %121 = vector.broadcast %cst_47 : bf16 to vector<2x1x128xbf16>
    %122 = vector.extract_strided_slice %120 {offsets = [0, 0, 0], sizes = [2, 15, 128], strides = [1, 1, 1]} : vector<2x16x128xbf16> to vector<2x15x128xbf16>
    %123 = tpu.concatenate %121, %122 in 1 : vector<2x1x128xbf16>, vector<2x15x128xbf16> -> vector<2x16x128xbf16>
    %124 = tpu.iota {dimensions = array<i32: 1>} : vector<2x16x128xi32>
    %c3_i32_48 = arith.constant 3 : i32
    %125 = vector.broadcast %c3_i32_48 : i32 to vector<2x16x128xi32>
    %126 = arith.andi %124, %125 : vector<2x16x128xi32>
    %c1_i32_49 = arith.constant 1 : i32
    %127 = vector.broadcast %c1_i32_49 : i32 to vector<2x16x128xi32>
    %128 = arith.cmpi sge, %126, %127 : vector<2x16x128xi32>
    %cst_50 = arith.constant 0.000000e+00 : bf16
    %129 = vector.broadcast %cst_50 : bf16 to vector<2x16x128xbf16>
    %130 = arith.select %128, %123, %129 : vector<2x16x128xi1>, vector<2x16x128xbf16>
    %131 = vector.extract_strided_slice %68 {offsets = [0, 4, 0], sizes = [2, 12, 128], strides = [1, 1, 1]} : vector<2x16x128xbf16> to vector<2x12x128xbf16>
    %cst_51 = arith.constant 0.000000e+00 : bf16
    %132 = vector.broadcast %cst_51 : bf16 to vector<2x4x128xbf16>
    %133 = tpu.concatenate %131, %132 in 1 : vector<2x12x128xbf16>, vector<2x4x128xbf16> -> vector<2x16x128xbf16>
    %134 = vector.extract_strided_slice %68 {offsets = [0, 4, 0], sizes = [2, 12, 128], strides = [1, 1, 1]} : vector<2x16x128xbf16> to vector<2x12x128xbf16>
    %cst_52 = arith.constant 0.000000e+00 : bf16
    %135 = vector.broadcast %cst_52 : bf16 to vector<2x4x128xbf16>
    %136 = tpu.concatenate %134, %135 in 1 : vector<2x12x128xbf16>, vector<2x4x128xbf16> -> vector<2x16x128xbf16>
    %137 = vector.extract_strided_slice %136 {offsets = [0, 1, 0], sizes = [2, 15, 128], strides = [1, 1, 1]} : vector<2x16x128xbf16> to vector<2x15x128xbf16>
    %cst_53 = arith.constant 0.000000e+00 : bf16
    %138 = vector.broadcast %cst_53 : bf16 to vector<2x1x128xbf16>
    %139 = tpu.concatenate %137, %138 in 1 : vector<2x15x128xbf16>, vector<2x1x128xbf16> -> vector<2x16x128xbf16>
    %140 = tpu.iota {dimensions = array<i32: 1>} : vector<2x16x128xi32>
    %c3_i32_54 = arith.constant 3 : i32
    %141 = vector.broadcast %c3_i32_54 : i32 to vector<2x16x128xi32>
    %142 = arith.andi %140, %141 : vector<2x16x128xi32>
    %c3_i32_55 = arith.constant 3 : i32
    %143 = vector.broadcast %c3_i32_55 : i32 to vector<2x16x128xi32>
    %144 = arith.cmpi slt, %142, %143 : vector<2x16x128xi32>
    %cst_56 = arith.constant 0.000000e+00 : bf16
    %145 = vector.broadcast %cst_56 : bf16 to vector<2x16x128xbf16>
    %146 = arith.select %144, %139, %145 : vector<2x16x128xi1>, vector<2x16x128xbf16>
    %147 = tpu.concatenate %81, %84, %97, %107, %68, %117, %130, %133, %146 in 2 : vector<2x16x128xbf16>, vector<2x16x128xbf16>, vector<2x16x128xbf16>, vector<2x16x128xbf16>, vector<2x16x128xbf16>, vector<2x16x128xbf16>, vector<2x16x128xbf16>, vector<2x16x128xbf16>, vector<2x16x128xbf16> -> vector<2x16x1152xbf16>
    %148 = vector.shape_cast %147 : vector<2x16x1152xbf16> to vector<32x1152xbf16>
    %c0_57 = arith.constant 0 : index
    %c0_58 = arith.constant 0 : index
    %149 = vector.load %arg6[%c0_57, %c0_58] : memref<1152x128xbf16, #tpu.memory_space<vmem>>, vector<1152x128xbf16>
    %cst_59 = arith.constant dense<0.000000e+00> : vector<32x128xf32>
    %150 = tpu.matmul %148, %149, %cst_59 {dimension_numbers = #tpu.dot_dimension_numbers<[1], [0], [0], [1], [0, 0, 1, 1], [], []>} : vector<32x1152xbf16>, vector<1152x128xbf16>, vector<32x128xf32> -> vector<32x128xf32>
    %c0_60 = arith.constant 0 : index
    %c0_61 = arith.constant 0 : index
    %151 = vector.load %arg7[%c0_60, %c0_61] : memref<1x128xf32, #tpu.memory_space<vmem>>, vector<1x128xf32>
    %152 = vector.broadcast %151 : vector<1x128xf32> to vector<32x128xf32>
    %153 = arith.addf %150, %152 : vector<32x128xf32>
    %cst_62 = arith.constant 0.000000e+00 : f32
    %154 = vector.broadcast %cst_62 : f32 to vector<32x128xf32>
    %155 = arith.maximumf %153, %154 : vector<32x128xf32>
    %156 = arith.truncf %155 : vector<32x128xf32> to vector<32x128xbf16>
    %157 = vector.shape_cast %156 : vector<32x128xbf16> to vector<2x16x128xbf16>
    %cst_63 = arith.constant 0.000000e+00 : bf16
    %158 = vector.broadcast %cst_63 : bf16 to vector<2x4x128xbf16>
    %159 = vector.extract_strided_slice %157 {offsets = [0, 0, 0], sizes = [2, 12, 128], strides = [1, 1, 1]} : vector<2x16x128xbf16> to vector<2x12x128xbf16>
    %160 = tpu.concatenate %158, %159 in 1 : vector<2x4x128xbf16>, vector<2x12x128xbf16> -> vector<2x16x128xbf16>
    %cst_64 = arith.constant 0.000000e+00 : bf16
    %161 = vector.broadcast %cst_64 : bf16 to vector<2x1x128xbf16>
    %162 = vector.extract_strided_slice %160 {offsets = [0, 0, 0], sizes = [2, 15, 128], strides = [1, 1, 1]} : vector<2x16x128xbf16> to vector<2x15x128xbf16>
    %163 = tpu.concatenate %161, %162 in 1 : vector<2x1x128xbf16>, vector<2x15x128xbf16> -> vector<2x16x128xbf16>
    %164 = tpu.iota {dimensions = array<i32: 1>} : vector<2x16x128xi32>
    %c3_i32_65 = arith.constant 3 : i32
    %165 = vector.broadcast %c3_i32_65 : i32 to vector<2x16x128xi32>
    %166 = arith.andi %164, %165 : vector<2x16x128xi32>
    %c1_i32_66 = arith.constant 1 : i32
    %167 = vector.broadcast %c1_i32_66 : i32 to vector<2x16x128xi32>
    %168 = arith.cmpi sge, %166, %167 : vector<2x16x128xi32>
    %cst_67 = arith.constant 0.000000e+00 : bf16
    %169 = vector.broadcast %cst_67 : bf16 to vector<2x16x128xbf16>
    %170 = arith.select %168, %163, %169 : vector<2x16x128xi1>, vector<2x16x128xbf16>
    %cst_68 = arith.constant 0.000000e+00 : bf16
    %171 = vector.broadcast %cst_68 : bf16 to vector<2x4x128xbf16>
    %172 = vector.extract_strided_slice %157 {offsets = [0, 0, 0], sizes = [2, 12, 128], strides = [1, 1, 1]} : vector<2x16x128xbf16> to vector<2x12x128xbf16>
    %173 = tpu.concatenate %171, %172 in 1 : vector<2x4x128xbf16>, vector<2x12x128xbf16> -> vector<2x16x128xbf16>
    %cst_69 = arith.constant 0.000000e+00 : bf16
    %174 = vector.broadcast %cst_69 : bf16 to vector<2x4x128xbf16>
    %175 = vector.extract_strided_slice %157 {offsets = [0, 0, 0], sizes = [2, 12, 128], strides = [1, 1, 1]} : vector<2x16x128xbf16> to vector<2x12x128xbf16>
    %176 = tpu.concatenate %174, %175 in 1 : vector<2x4x128xbf16>, vector<2x12x128xbf16> -> vector<2x16x128xbf16>
    %177 = vector.extract_strided_slice %176 {offsets = [0, 1, 0], sizes = [2, 15, 128], strides = [1, 1, 1]} : vector<2x16x128xbf16> to vector<2x15x128xbf16>
    %cst_70 = arith.constant 0.000000e+00 : bf16
    %178 = vector.broadcast %cst_70 : bf16 to vector<2x1x128xbf16>
    %179 = tpu.concatenate %177, %178 in 1 : vector<2x15x128xbf16>, vector<2x1x128xbf16> -> vector<2x16x128xbf16>
    %180 = tpu.iota {dimensions = array<i32: 1>} : vector<2x16x128xi32>
    %c3_i32_71 = arith.constant 3 : i32
    %181 = vector.broadcast %c3_i32_71 : i32 to vector<2x16x128xi32>
    %182 = arith.andi %180, %181 : vector<2x16x128xi32>
    %c3_i32_72 = arith.constant 3 : i32
    %183 = vector.broadcast %c3_i32_72 : i32 to vector<2x16x128xi32>
    %184 = arith.cmpi slt, %182, %183 : vector<2x16x128xi32>
    %cst_73 = arith.constant 0.000000e+00 : bf16
    %185 = vector.broadcast %cst_73 : bf16 to vector<2x16x128xbf16>
    %186 = arith.select %184, %179, %185 : vector<2x16x128xi1>, vector<2x16x128xbf16>
    %cst_74 = arith.constant 0.000000e+00 : bf16
    %187 = vector.broadcast %cst_74 : bf16 to vector<2x1x128xbf16>
    %188 = vector.extract_strided_slice %157 {offsets = [0, 0, 0], sizes = [2, 15, 128], strides = [1, 1, 1]} : vector<2x16x128xbf16> to vector<2x15x128xbf16>
    %189 = tpu.concatenate %187, %188 in 1 : vector<2x1x128xbf16>, vector<2x15x128xbf16> -> vector<2x16x128xbf16>
    %190 = tpu.iota {dimensions = array<i32: 1>} : vector<2x16x128xi32>
    %c3_i32_75 = arith.constant 3 : i32
    %191 = vector.broadcast %c3_i32_75 : i32 to vector<2x16x128xi32>
    %192 = arith.andi %190, %191 : vector<2x16x128xi32>
    %c1_i32_76 = arith.constant 1 : i32
    %193 = vector.broadcast %c1_i32_76 : i32 to vector<2x16x128xi32>
    %194 = arith.cmpi sge, %192, %193 : vector<2x16x128xi32>
    %cst_77 = arith.constant 0.000000e+00 : bf16
    %195 = vector.broadcast %cst_77 : bf16 to vector<2x16x128xbf16>
    %196 = arith.select %194, %189, %195 : vector<2x16x128xi1>, vector<2x16x128xbf16>
    %197 = vector.extract_strided_slice %157 {offsets = [0, 1, 0], sizes = [2, 15, 128], strides = [1, 1, 1]} : vector<2x16x128xbf16> to vector<2x15x128xbf16>
    %cst_78 = arith.constant 0.000000e+00 : bf16
    %198 = vector.broadcast %cst_78 : bf16 to vector<2x1x128xbf16>
    %199 = tpu.concatenate %197, %198 in 1 : vector<2x15x128xbf16>, vector<2x1x128xbf16> -> vector<2x16x128xbf16>
    %200 = tpu.iota {dimensions = array<i32: 1>} : vector<2x16x128xi32>
    %c3_i32_79 = arith.constant 3 : i32
    %201 = vector.broadcast %c3_i32_79 : i32 to vector<2x16x128xi32>
    %202 = arith.andi %200, %201 : vector<2x16x128xi32>
    %c3_i32_80 = arith.constant 3 : i32
    %203 = vector.broadcast %c3_i32_80 : i32 to vector<2x16x128xi32>
    %204 = arith.cmpi slt, %202, %203 : vector<2x16x128xi32>
    %cst_81 = arith.constant 0.000000e+00 : bf16
    %205 = vector.broadcast %cst_81 : bf16 to vector<2x16x128xbf16>
    %206 = arith.select %204, %199, %205 : vector<2x16x128xi1>, vector<2x16x128xbf16>
    %207 = vector.extract_strided_slice %157 {offsets = [0, 4, 0], sizes = [2, 12, 128], strides = [1, 1, 1]} : vector<2x16x128xbf16> to vector<2x12x128xbf16>
    %cst_82 = arith.constant 0.000000e+00 : bf16
    %208 = vector.broadcast %cst_82 : bf16 to vector<2x4x128xbf16>
    %209 = tpu.concatenate %207, %208 in 1 : vector<2x12x128xbf16>, vector<2x4x128xbf16> -> vector<2x16x128xbf16>
    %cst_83 = arith.constant 0.000000e+00 : bf16
    %210 = vector.broadcast %cst_83 : bf16 to vector<2x1x128xbf16>
    %211 = vector.extract_strided_slice %209 {offsets = [0, 0, 0], sizes = [2, 15, 128], strides = [1, 1, 1]} : vector<2x16x128xbf16> to vector<2x15x128xbf16>
    %212 = tpu.concatenate %210, %211 in 1 : vector<2x1x128xbf16>, vector<2x15x128xbf16> -> vector<2x16x128xbf16>
    %213 = tpu.iota {dimensions = array<i32: 1>} : vector<2x16x128xi32>
    %c3_i32_84 = arith.constant 3 : i32
    %214 = vector.broadcast %c3_i32_84 : i32 to vector<2x16x128xi32>
    %215 = arith.andi %213, %214 : vector<2x16x128xi32>
    %c1_i32_85 = arith.constant 1 : i32
    %216 = vector.broadcast %c1_i32_85 : i32 to vector<2x16x128xi32>
    %217 = arith.cmpi sge, %215, %216 : vector<2x16x128xi32>
    %cst_86 = arith.constant 0.000000e+00 : bf16
    %218 = vector.broadcast %cst_86 : bf16 to vector<2x16x128xbf16>
    %219 = arith.select %217, %212, %218 : vector<2x16x128xi1>, vector<2x16x128xbf16>
    %220 = vector.extract_strided_slice %157 {offsets = [0, 4, 0], sizes = [2, 12, 128], strides = [1, 1, 1]} : vector<2x16x128xbf16> to vector<2x12x128xbf16>
    %cst_87 = arith.constant 0.000000e+00 : bf16
    %221 = vector.broadcast %cst_87 : bf16 to vector<2x4x128xbf16>
    %222 = tpu.concatenate %220, %221 in 1 : vector<2x12x128xbf16>, vector<2x4x128xbf16> -> vector<2x16x128xbf16>
    %223 = vector.extract_strided_slice %157 {offsets = [0, 4, 0], sizes = [2, 12, 128], strides = [1, 1, 1]} : vector<2x16x128xbf16> to vector<2x12x128xbf16>
    %cst_88 = arith.constant 0.000000e+00 : bf16
    %224 = vector.broadcast %cst_88 : bf16 to vector<2x4x128xbf16>
    %225 = tpu.concatenate %223, %224 in 1 : vector<2x12x128xbf16>, vector<2x4x128xbf16> -> vector<2x16x128xbf16>
    %226 = vector.extract_strided_slice %225 {offsets = [0, 1, 0], sizes = [2, 15, 128], strides = [1, 1, 1]} : vector<2x16x128xbf16> to vector<2x15x128xbf16>
    %cst_89 = arith.constant 0.000000e+00 : bf16
    %227 = vector.broadcast %cst_89 : bf16 to vector<2x1x128xbf16>
    %228 = tpu.concatenate %226, %227 in 1 : vector<2x15x128xbf16>, vector<2x1x128xbf16> -> vector<2x16x128xbf16>
    %229 = tpu.iota {dimensions = array<i32: 1>} : vector<2x16x128xi32>
    %c3_i32_90 = arith.constant 3 : i32
    %230 = vector.broadcast %c3_i32_90 : i32 to vector<2x16x128xi32>
    %231 = arith.andi %229, %230 : vector<2x16x128xi32>
    %c3_i32_91 = arith.constant 3 : i32
    %232 = vector.broadcast %c3_i32_91 : i32 to vector<2x16x128xi32>
    %233 = arith.cmpi slt, %231, %232 : vector<2x16x128xi32>
    %cst_92 = arith.constant 0.000000e+00 : bf16
    %234 = vector.broadcast %cst_92 : bf16 to vector<2x16x128xbf16>
    %235 = arith.select %233, %228, %234 : vector<2x16x128xi1>, vector<2x16x128xbf16>
    %236 = tpu.concatenate %170, %173, %186, %196, %157, %206, %219, %222, %235 in 2 : vector<2x16x128xbf16>, vector<2x16x128xbf16>, vector<2x16x128xbf16>, vector<2x16x128xbf16>, vector<2x16x128xbf16>, vector<2x16x128xbf16>, vector<2x16x128xbf16>, vector<2x16x128xbf16>, vector<2x16x128xbf16> -> vector<2x16x1152xbf16>
    %237 = vector.shape_cast %236 : vector<2x16x1152xbf16> to vector<32x1152xbf16>
    %c0_93 = arith.constant 0 : index
    %c0_94 = arith.constant 0 : index
    %238 = vector.load %arg8[%c0_93, %c0_94] : memref<1152x128xbf16, #tpu.memory_space<vmem>>, vector<1152x128xbf16>
    %cst_95 = arith.constant dense<0.000000e+00> : vector<32x128xf32>
    %239 = tpu.matmul %237, %238, %cst_95 {dimension_numbers = #tpu.dot_dimension_numbers<[1], [0], [0], [1], [0, 0, 1, 1], [], []>} : vector<32x1152xbf16>, vector<1152x128xbf16>, vector<32x128xf32> -> vector<32x128xf32>
    %c0_96 = arith.constant 0 : index
    %c0_97 = arith.constant 0 : index
    %240 = vector.load %arg9[%c0_96, %c0_97] : memref<1x128xf32, #tpu.memory_space<vmem>>, vector<1x128xf32>
    %241 = vector.broadcast %240 : vector<1x128xf32> to vector<32x128xf32>
    %242 = arith.addf %239, %241 : vector<32x128xf32>
    %243 = arith.addf %242, %66 : vector<32x128xf32>
    %cst_98 = arith.constant 0.000000e+00 : f32
    %244 = vector.broadcast %cst_98 : f32 to vector<32x128xf32>
    %245 = arith.maximumf %243, %244 : vector<32x128xf32>
    %246 = vector.shape_cast %245 : vector<32x128xf32> to vector<2x16x128xf32>
    %cst_99 = arith.constant dense<0.000000e+00> : vector<2x128xf32>
    %247 = vector.multi_reduction <add>, %246, %cst_99 [1] : vector<2x16x128xf32> to vector<2x128xf32>
    %cst_100 = arith.constant 6.250000e-02 : f32
    %248 = vector.broadcast %cst_100 : f32 to vector<2x128xf32>
    %249 = arith.mulf %247, %248 : vector<2x128xf32>
    %250 = arith.truncf %249 : vector<2x128xf32> to vector<2x128xbf16>
    %c0_101 = arith.constant 0 : index
    %c0_102 = arith.constant 0 : index
    %251 = vector.load %arg10[%c0_101, %c0_102] : memref<128x128xbf16, #tpu.memory_space<vmem>>, vector<128x128xbf16>
    %cst_103 = arith.constant dense<0.000000e+00> : vector<2x128xf32>
    %252 = tpu.matmul %250, %251, %cst_103 {dimension_numbers = #tpu.dot_dimension_numbers<[1], [0], [0], [1], [0, 0, 1, 1], [], []>} : vector<2x128xbf16>, vector<128x128xbf16>, vector<2x128xf32> -> vector<2x128xf32>
    %c0_104 = arith.constant 0 : index
    %c0_105 = arith.constant 0 : index
    %253 = vector.load %arg11[%c0_104, %c0_105] : memref<1x128xf32, #tpu.memory_space<vmem>>, vector<1x128xf32>
    %254 = vector.broadcast %253 : vector<1x128xf32> to vector<2x128xf32>
    %255 = arith.addf %252, %254 : vector<2x128xf32>
    %c0_106 = arith.constant 0 : index
    %c0_107 = arith.constant 0 : index
    %256 = vector.load %arg12[%c0_106, %c0_107] : memref<2x128xf32, #tpu.memory_space<vmem>>, vector<2x128xf32>
    tpu.vector_store %arg12[%c0_106, %c0_107], %255 {strides = array<i32>} : memref<2x128xf32, #tpu.memory_space<vmem>>, vector<2x128xf32>,
    return
  }
  func.func @transform_0(%arg0: i32) -> (i32, i32, i32, i32) {
    %c0_i32 = arith.constant 0 : i32
    %c0_i32_0 = arith.constant 0 : i32
    %c0_i32_1 = arith.constant 0 : i32
    %c0_i32_2 = arith.constant 0 : i32
    return %arg0, %c0_i32, %c0_i32_0, %c0_i32_1 : i32, i32, i32, i32
  }
  func.func @transform_1(%arg0: i32) -> (i32, i32) {
    %c0_i32 = arith.constant 0 : i32
    %c0_i32_0 = arith.constant 0 : i32
    %c0_i32_1 = arith.constant 0 : i32
    return %c0_i32, %c0_i32_0 : i32, i32
  }
  func.func @transform_2(%arg0: i32) -> (i32, i32) {
    %c0_i32 = arith.constant 0 : i32
    %c0_i32_0 = arith.constant 0 : i32
    %c0_i32_1 = arith.constant 0 : i32
    return %c0_i32, %c0_i32_0 : i32, i32
  }
  func.func @transform_3(%arg0: i32) -> (i32, i32) {
    %c0_i32 = arith.constant 0 : i32
    %c0_i32_0 = arith.constant 0 : i32
    %c0_i32_1 = arith.constant 0 : i32
    return %c0_i32, %c0_i32_0 : i32, i32
  }
  func.func @transform_4(%arg0: i32) -> (i32, i32) {
    %c0_i32 = arith.constant 0 : i32
    %c0_i32_0 = arith.constant 0 : i32
    %c0_i32_1 = arith.constant 0 : i32
    return %c0_i32, %c0_i32_0 : i32, i32
  }
  func.func @transform_5(%arg0: i32) -> (i32, i32) {
    %c0_i32 = arith.constant 0 : i32
    %c0_i32_0 = arith.constant 0 : i32
    %c0_i32_1 = arith.constant 0 : i32
    return %c0_i32, %c0_i32_0 : i32, i32
  }
  func.func @transform_6(%arg0: i32) -> (i32, i32) {
    %c0_i32 = arith.constant 0 : i32
    %c0_i32_0 = arith.constant 0 : i32
    %c0_i32_1 = arith.constant 0 : i32
    return %c0_i32, %c0_i32_0 : i32, i32
  }
  func.func @transform_7(%arg0: i32) -> (i32, i32) {
    %c0_i32 = arith.constant 0 : i32
    %c0_i32_0 = arith.constant 0 : i32
    %c0_i32_1 = arith.constant 0 : i32
    return %c0_i32, %c0_i32_0 : i32, i32
  }
  func.func @transform_8(%arg0: i32) -> (i32, i32) {
    %c0_i32 = arith.constant 0 : i32
    %c0_i32_0 = arith.constant 0 : i32
    %c0_i32_1 = arith.constant 0 : i32
    return %c0_i32, %c0_i32_0 : i32, i32
  }
  func.func @transform_9(%arg0: i32) -> (i32, i32) {
    %c0_i32 = arith.constant 0 : i32
    %c0_i32_0 = arith.constant 0 : i32
    %c0_i32_1 = arith.constant 0 : i32
    return %c0_i32, %c0_i32_0 : i32, i32
  }
  func.func @transform_10(%arg0: i32) -> (i32, i32) {
    %c0_i32 = arith.constant 0 : i32
    %c0_i32_0 = arith.constant 0 : i32
    %c0_i32_1 = arith.constant 0 : i32
    return %c0_i32, %c0_i32_0 : i32, i32
  }
  func.func @transform_11(%arg0: i32) -> (i32, i32) {
    %c0_i32 = arith.constant 0 : i32
    %c0_i32_0 = arith.constant 0 : i32
    return %arg0, %c0_i32 : i32, i32
  }
}

</mosaic_0001>

<bundles_post_ra>
// kernel: model_builder_forward.1
= control target key start
LH: loop header
LB: loop body
LE: loop exit
PB: predicated region body
PF: predicated region fallthrough
CT: control target
= control target key end

     0   :  { %v328_v50 = vlaneseq  ;;  %vm323_vm4 = vcmask 1040384   ;;  %vm324_vm5 = vsmask.f32 256  ;;  %vm301_vm8 = vcmask 1041408   ;;  %s5441_s1 = inlined_call_operand.vmem [shape: bf16[128,128], index: 1, kind: input, shape index: {}]   ;;  %s5442_s0 = inlined_call_operand.vmem [shape: bf16[2,4,16,128], index: 0, kind: input, shape index: {}]   ;;  %s5443_s3 = inlined_call_operand.vmem [shape: bf16[1152,128], index: 3, kind: input, shape index: {}]   ;;  %s5444_s2 = inlined_call_operand.vmem [shape: f32[1,128], index: 2, kind: input, shape index: {}]   ;;  %s5445_s5 = inlined_call_operand.vmem [shape: bf16[1152,128], index: 5, kind: input, shape index: {}]   ;;  %s5446_s4 = inlined_call_operand.vmem [shape: f32[1,128], index: 4, kind: input, shape index: {}]   ;;  %s5447_s7 = inlined_call_operand.vmem [shape: bf16[1152,128], index: 7, kind: input, shape index: {}]   ;;  %s5448_s6 = inlined_call_operand.vmem [shape: f32[1,128], index: 6, kind: input, shape index: {}]   ;;  %s5449_s9 = inlined_call_operand.vmem [shape: bf16[128,128], index: 9, kind: input, shape index: {}]   ;;  %s5450_s8 = inlined_call_operand.vmem [shape: f32[1,128], index: 8, kind: input, shape index: {}]   ;;  %s5451_s10 = inlined_call_operand.vmem [shape: f32[1,128], index: 10, kind: input, shape index: {}]   ;;  %s5452_s11 = inlined_call_operand.vmem [shape: f32[2,128], index: 11, kind: output, shape index: {}]  }
   0x1   :  { %v4066_v0 = vld [vmem:[%s5441_s1] sm:$0xff]   ;;  %v4067_v1 = vld [vmem:[%s5441_s1 + $0x8] sm:$0xff]   ;;  %v4068_v2 = vld [vmem:[%s5441_s1 + $0x10] sm:$0xff]   ;;  %vm1263_vm14 = vcmask 1047552   ;;  %vm1264_vm15 = vsmask.f32 7424 }
   0x2   :  { %3951 = vmatprep.subr.bf16.mxu0 %v4066_v0  ;;  %v4069_v3 = vld [vmem:[%s5441_s1 + $0x18] sm:$0xff]   ;;  %v4074_v4 = vld [vmem:[%s5442_s0] sm:$0xff]   ;;  %v4071_v6 = vld [vmem:[%s5441_s1 + $0x28] sm:$0xff]   ;;  %v4519_v51 = vshrl.u32 %v328_v50, 7 }
   0x3   :  { %3952 = vmatpush3.bf16.msra.mxu0 %v4066_v0  ;;  %3967 = vmatprep.mubr.bf16.mxu0 %v4074_v4  ;;  %v4070_v5 = vld [vmem:[%s5441_s1 + $0x20] sm:$0xff]   ;;  %v4072_v7 = vld [vmem:[%s5441_s1 + $0x30] sm:$0xff]   ;;  %v4073_v10 = vld [vmem:[%s5441_s1 + $0x38] sm:$0xff]   ;;  %v4306_v4 = vmov 0  }
   0x4   :  { %3953 = vmatprep.subr.bf16.mxu0 %v4067_v1  ;;  %v4086_v8 = vld [vmem:[%s5443_s3 + $0x40] sm:$0xff]   ;;  %v4090_v11 = vld [vmem:[%s5443_s3 + $0x48] sm:$0xff]   ;;  %v4076_v15 = vld [vmem:[%s5442_s0 + $0x10] sm:$0xff]   ;;  %v4522_v52 = vadd.s32 8, %v4519_v51  ;;  %v331_v53 = vand.u32 3, %v4519_v51 }
   0x5   :  { %3576 = vmatprep.subr.bf16.mxu1 %v4086_v8  ;;  %v4088_v9 = vld [vmem:[%s5443_s3] sm:$0xff]   ;;  %v4092_v12 = vld [vmem:[%s5443_s3 + $0x8] sm:$0xff]   ;;  %v4087_v19 = vld [vmem:[%s5443_s3 + $0xd0] sm:$0xff]  }
   0x6   :  { %3577 = vmatpush3.bf16.msra.mxu1 %v4088_v9  ;;  %v4082_v13 = vld [vmem:[%s5443_s3 + $0xc0] sm:$0xff]   ;;  %v4075_v14 = vld [vmem:[%s5442_s0 + $0x8] sm:$0xff]   ;;  %v4077_v20 = vld [vmem:[%s5442_s0 + $0x18] sm:$0xff]   ;;  %v332_v54 = vand.u32 3, %v4522_v52  ;;  %vm4533_vm0 = vcmp.ge.s32.totalorder %v331_v53, 1  ;;  %vm4873_vm10 = vcmp.lt.s32.totalorder %v331_v53, 3 }
   0x7   :  { %3954 = vmatpush3.bf16.msra.mxu0 %v4067_v1  ;;  %3578 = vmatprep.subr.bf16.mxu1 %v4090_v11  ;;  %v4083_v16 = vld [vmem:[%s5443_s3 + $0x80] sm:$0xff]   ;;  %v4084_v17 = vld [vmem:[%s5443_s3 + $0xc8] sm:$0xff]   ;;  %v4089_v22 = vld [vmem:[%s5443_s3 + $0x90] sm:$0xff]  }
   0x8   :  { %3955 = vmatprep.subr.bf16.mxu0 %v4068_v2  ;;  %v4085_v18 = vld [vmem:[%s5443_s3 + $0x88] sm:$0xff]   ;;  %v4078_v21 = vld [vmem:[%s5442_s0 + $0x20] sm:$0xff]   ;;  %v4091_v23 = vld [vmem:[%s5443_s3 + $0xd8] sm:$0xff]   ;;  %vm4539_vm1 = vcmp.ge.s32.totalorder %v332_v54, 1  ;;  %vm1269_vm11 = vcmp.lt.s32.totalorder %v332_v54, 3 }
   0x9   :  { %v4093_v24 = vld [vmem:[%s5443_s3 + $0x98] sm:$0xff]   ;;  %v4079_v25 = vld [vmem:[%s5442_s0 + $0x28] sm:$0xff]   ;;  %v4080_v26 = vld [vmem:[%s5442_s0 + $0x30] sm:$0xff]  }
   0xa   :  { %3579 = vmatpush3.bf16.msra.mxu1 %v4092_v12  ;;  %v4081_v27 = vld [vmem:[%s5442_s0 + $0x38] sm:$0xff]   ;;  %v4094_v28 = vld [vmem:[%s5443_s3 + $0x50] sm:$0xff]   ;;  %v4095_v29 = vld [vmem:[%s5443_s3 + $0xe0] sm:$0xff]  }
   0xb   :  { %3956 = vmatpush3.bf16.msra.mxu0 %v4068_v2  ;;  %v4096_v30 = vld [vmem:[%s5443_s3 + $0x10] sm:$0xff]   ;;  %v4097_v31 = vld [vmem:[%s5443_s3 + $0xa0] sm:$0xff]   ;;  %3580 = vmatprep.subr.bf16.mxu1 %v4094_v28  ;;  %v4098_v32 = vld [vmem:[%s5443_s3 + $0x58] sm:$0xff]  }
   0xc   :  { %3957 = vmatprep.subr.bf16.mxu0 %v4069_v3  ;;  %v4099_v33 = vld [vmem:[%s5443_s3 + $0xe8] sm:$0xff]   ;;  %v4100_v34 = vld [vmem:[%s5443_s3 + $0x18] sm:$0xff]   ;;  %v4102_v36 = vld [vmem:[%s5443_s3 + $0x60] sm:$0xff]  }
   0xd   :  { %v4101_v35 = vld [vmem:[%s5443_s3 + $0xa8] sm:$0xff]   ;;  %v4103_v37 = vld [vmem:[%s5443_s3 + $0xf0] sm:$0xff]   ;;  %v4104_v38 = vld [vmem:[%s5443_s3 + $0x20] sm:$0xff]  }
   0xe   :  { %3581 = vmatpush3.bf16.msra.mxu1 %v4096_v30  ;;  %v4105_v39 = vld [vmem:[%s5443_s3 + $0xb0] sm:$0xff]   ;;  %v4106_v40 = vld [vmem:[%s5443_s3 + $0x68] sm:$0xff]   ;;  %v4107_v41 = vld [vmem:[%s5443_s3 + $0xf8] sm:$0xff]  }
   0xf   :  { %3958 = vmatpush3.bf16.msra.mxu0 %v4069_v3  ;;  %3582 = vmatprep.subr.bf16.mxu1 %v4098_v32  ;;  %v4108_v42 = vld [vmem:[%s5443_s3 + $0x28] sm:$0xff]   ;;  %v4109_v43 = vld [vmem:[%s5443_s3 + $0xb8] sm:$0xff]   ;;  %v4110_v44 = vld [vmem:[%s5443_s3 + $0x70] sm:$0xff]  }
  0x10   :  { %3959 = vmatprep.subr.bf16.mxu0 %v4070_v5  ;;  %v4111_v45 = vld [vmem:[%s5443_s3 + $0x1c0] sm:$0xff]   ;;  %v4112_v46 = vld [vmem:[%s5443_s3 + $0x30] sm:$0xff]   ;;  %v4114_v47 = vld [vmem:[%s5443_s3 + $0x78] sm:$0xff]  }
  0x11   :  { %v4116_v48 = vld [vmem:[%s5443_s3 + $0x38] sm:$0xff]   ;;  %v4118_v49 = vld [vmem:[%s5443_s3 + $0x140] sm:$0xff]   ;;  %vm335_vm2 = vmpackc.low %vm4533_vm0, %vm4533_vm0 }
  0x12   :  { %3583 = vmatpush3.bf16.msra.mxu1 %v4100_v34  ;;  %v4529_v55 = vld [vmem:[%s5444_s2] ss:$0 sm:$0xff]  ;;  %vm336_vm3 = vmpackc.low %vm4539_vm1, %vm4539_vm1  ;;  %v4119_v57 = vld [vmem:[%s5443_s3 + $0x1d0] sm:$0xff]  }
  0x13   :  { %3960 = vmatpush3.bf16.msra.mxu0 %v4070_v5  ;;  %3584 = vmatprep.subr.bf16.mxu1 %v4102_v36  ;;  %v337_v5 = vsel %vm335_vm2, 65537, %v4306_v4  ;;  %vm4565_vm6 = vmand %vm323_vm4, %vm324_vm5  ;;  %vm1312_vm2 = vcmask 1045504   ;;  %v4268_v34 = vld [vmem:[%s5447_s7 + $0x110] sm:$0xff]   ;;  %vm3166_vm4 = vcmask 1041409  }
  0x14   :  { %3961 = vmatprep.subr.bf16.mxu0 %v4071_v6  ;;  %vm4582_vm9 = vmneg %vm301_vm8 }
  0x15   :  { %vm1270_vm12 = vmpackc.low %vm4873_vm10, %vm4873_vm10 }
  0x16   :  { %3585 = vmatpush3.bf16.msra.mxu1 %v4104_v38  ;;  %vm1271_vm13 = vmpackc.low %vm1269_vm11, %vm1269_vm11 }
  0x17   :  { %3962 = vmatpush3.bf16.msra.mxu0 %v4071_v6  ;;  %3586 = vmatprep.subr.bf16.mxu1 %v4106_v40  ;;  %v338_v6 = vsel %vm336_vm3, 65537, %v4306_v4  ;;  %vm4931_vm1 = vmand %vm1263_vm14, %vm1264_vm15  ;;  %vm4308_vm3 = vmmov 0  }
  0x18   :  { %3963 = vmatprep.subr.bf16.mxu0 %v4072_v7  ;;  %v3280_v12 = vcombine.low %v337_v5, %v338_v6 }
  0x1a   :  { %3587 = vmatpush3.bf16.msra.mxu1 %v4108_v42  ;;  %vm4569_vm7 = vcmp.ne.s16.totalorder %v3280_v12, 0 }
  0x1b   :  { %3964 = vmatpush3.bf16.msra.mxu0 %v4072_v7  ;;  %3588 = vmatprep.subr.bf16.mxu1 %v4110_v44 }
  0x1c   :  { %3965 = vmatprep.subr.bf16.mxu0 %v4073_v10 }
  0x1e   :  { %3589 = vmatpush3.bf16.msra.mxu1 %v4112_v46 }
  0x1f   :  { %3966 = vmatpush3.bf16.msra.mxu0 %v4073_v10  ;;  %3590 = vmatprep.subr.bf16.mxu1 %v4114_v47 }
  0x20   :  { %3604 = vmatprep.subr.bf16.mxu0 %v4082_v13 }
  0x22   :  { %3968 = vmatmul.mubr.bf16.vlgmr.msra.gmra.mrb[0].mxu0 %v4075_v14  ;;  %3591 = vmatpush3.bf16.msra.mxu1 %v4116_v48 }
  0x23   :  { %3971 = vmatprep.mubr.bf16.mxu0 %v4076_v15  ;;  %3605 = vmatpush3.bf16.msra.mxu0 %v4083_v16 }
  0x24   :  { %3606 = vmatprep.subr.bf16.mxu0 %v4084_v17  ;;  %3632 = vmatprep.subr.bf16.mxu1 %v4118_v49  ;;  %v4117_v49 = vld [vmem:[%s5443_s3 + $0x188] sm:$0xff]  }
  0x27   :  { %3607 = vmatpush3.bf16.msra.mxu0 %v4085_v18 }
  0x28   :  { %3608 = vmatprep.subr.bf16.mxu0 %v4087_v19 }
  0x2a   :  { %3972 = vmatmul.mubr.bf16.gmra.mrb[4].mxu0 %v4077_v20 }
  0x2b   :  { %3975 = vmatprep.mubr.bf16.mxu0 %v4078_v21  ;;  %3609 = vmatpush3.bf16.msra.mxu0 %v4089_v22 }
  0x2c   :  { %3610 = vmatprep.subr.bf16.mxu0 %v4091_v23  ;;  %v4294_v23 = vld [vmem:[%s5447_s7 + $0x220] sm:$0xff]  }
  0x2f   :  { %3611 = vmatpush3.bf16.msra.mxu0 %v4093_v24  ;;  %v4296_v24 = vld [vmem:[%s5447_s7 + $0x230] sm:$0xff]  }
  0x30   :  { %3612 = vmatprep.subr.bf16.mxu0 %v4095_v29 }
  0x32   :  { %3976 = vmatmul.mubr.bf16.gmra.mrb[8].mxu0 %v4079_v25 }
  0x33   :  { %3979 = vmatprep.mubr.bf16.mxu0 %v4080_v26  ;;  %3613 = vmatpush3.bf16.msra.mxu0 %v4097_v31 }
  0x34   :  { %3614 = vmatprep.subr.bf16.mxu0 %v4099_v33 }
  0x37   :  { %3615 = vmatpush3.bf16.msra.mxu0 %v4101_v35  ;;  %v4113_v35 = vld [vmem:[%s5443_s3 + $0x180] sm:$0xff]  }
  0x38   :  { %3616 = vmatprep.subr.bf16.mxu0 %v4103_v37 }
  0x3a   :  { %3980 = vmatmul.mubr.bf16.gmra.mrb[12].mxu0 %v4081_v27 }
  0x3b   :  { %3617 = vmatpush3.bf16.msra.mxu0 %v4105_v39  ;;  %v4115_v39 = vld [vmem:[%s5443_s3 + $0x1c8] sm:$0xff]  }
  0x3c   :  { %3618 = vmatprep.subr.bf16.mxu0 %v4107_v41 }
  0x3f   :  { %3619 = vmatpush3.bf16.msra.mxu0 %v4109_v43 }
  0x40   :  { %3660 = vmatprep.subr.bf16.mxu0 %v4111_v45 }
  0xf5   :  { %v3969_v58 = vpop.f32.mrb[0].mxu0 }
  0xf6   :  { %v219_v59 = vadd.f32 %v3969_v58, %v4529_v55  ;;  %v210_v60 = vpop.f32.mrb[1].mxu0 }
  0xf7   :  { %v211_v61 = vadd.f32 %v4529_v55, %v210_v60  ;;  %v3970_v62 = vpop.f32.mrb[2].mxu0 }
  0xf8   :  { %v222_v63 = vadd.f32 %v3970_v62, %v4529_v55  ;;  %v213_v0 = vpop.f32.mrb[3].mxu0  ;;  %v275_v2 = vmax.f32 %v219_v59, 0.0 }
  0xf9   :  { %v214_v1 = vadd.f32 %v4529_v55, %v213_v0  ;;  %v273_v7 = vmax.f32 %v211_v61, 0.0 }
  0xfa   :  { %v276_v3 = vmax.f32 %v222_v63, 0.0 }
  0xfb   :  { %v274_v8 = vmax.f32 %v214_v1, 0.0  ;;  %v4120_v1 = vld [vmem:[%s5443_s3 + $0x100] sm:$0xff]  }
  0xfc   :  { %v4555_v9 = vpack.c.bf16 %v276_v3, %v275_v2  ;;  %v4121_v2 = vld [vmem:[%s5443_s3 + $0x190] sm:$0xff]  }
  0xfd   :  { %v4557_v10 = vpack.c.bf16 %v274_v8, %v273_v7  ;;  %v3973_v11 = vpop.f32.mrb[4].mxu0  ;;  %v4122_v7 = vld [vmem:[%s5443_s3 + $0x148] sm:$0xff]   ;;  %v4123_v8 = vld [vmem:[%s5443_s3 + $0x1d8] sm:$0xff]  }
  0xfe   :  { %v356_v13 = vshrl.u32 %v4555_v9, 16  ;;  %v235_v14 = vadd.f32 %v3973_v11, %v4529_v55  ;;  %v226_v15 = vpop.f32.mrb[5].mxu0  ;;  %v359_v21 = vshll.u32 %v4555_v9, 16 }
  0xff   :  { %v227_v16 = vadd.f32 %v4529_v55, %v226_v15  ;;  %v3974_v17 = vpop.f32.mrb[6].mxu0 }
 0x100   :  { %v238_v18 = vadd.f32 %v3974_v17, %v4529_v55  ;;  %v229_v19 = vpop.f32.mrb[7].mxu0  ;;  %v358_v20 = vrot.slane %v356_v13, 7  ;;  %v279_v25 = vmax.f32 %v235_v14, 0.0 }
 0x101   :  { %v230_v22 = vadd.f32 %v4529_v55, %v229_v19  ;;  %v277_v28 = vmax.f32 %v227_v16, 0.0 }
 0x102   :  { %v280_v26 = vmax.f32 %v238_v18, 0.0  ;;  %v361_v27 = vor.u32 %v359_v21, %v358_v20  ;;  %v4124_v20 = vld [vmem:[%s5443_s3 + $0x108] sm:$0xff]   ;;  %v4125_v21 = vld [vmem:[%s5443_s3 + $0x198] sm:$0xff]  }
 0x103   :  { %v278_v29 = vmax.f32 %v230_v22, 0.0 }
 0x104   :  { %v4573_v30 = vpack.c.bf16 %v280_v26, %v279_v25  ;;  %v371_v31 = vsel %vm4565_vm6, 0, %v361_v27  ;;  %v4126_v27 = vld [vmem:[%s5443_s3 + $0x150] sm:$0xff]  }
 0x105   :  { %v4577_v32 = vpack.c.bf16 %v278_v29, %v277_v28  ;;  %3360 = vmatprep.mubr.msk.bf16.mxu0 %vm4569_vm7, %v371_v31  ;;  %v3977_v33 = vpop.f32.mrb[8].mxu0  ;;  %v4127_v29 = vld [vmem:[%s5443_s3 + $0x1e0] sm:$0xff]  }
 0x106   :  { %v299_v36 = vrot.slane %v4573_v30, 6  ;;  %v251_v37 = vadd.f32 %v3977_v33, %v4529_v55  ;;  %v242_v38 = vpop.f32.mrb[9].mxu0 }
 0x107   :  { %v243_v40 = vadd.f32 %v4529_v55, %v242_v38  ;;  %v3978_v41 = vpop.f32.mrb[10].mxu0  ;;  %v347_v42 = vrot.slane %v4577_v32, 6  ;;  %v4130_v38 = vld [vmem:[%s5443_s3 + $0x158] sm:$0xff]  }
 0x108   :  { %v283_v43 = vmax.f32 %v251_v37, 0.0  ;;  %3362 = vmatmul.mubr.msk.bf16.vlgmr.msra.gmra.mrb[16].mxu0 %vm4582_vm9, %v299_v36  ;;  %v254_v44 = vadd.f32 %v3978_v41, %v4529_v55  ;;  %v245_v45 = vpop.f32.mrb[11].mxu0  ;;  %v304_v46 = vsel %vm301_vm8, 0, %v299_v36  ;;  %v4129_v36 = vld [vmem:[%s5443_s3 + $0x1a0] sm:$0xff]  }
 0x109   :  { %v281_v47 = vmax.f32 %v243_v40, 0.0  ;;  %3661 = vmatpush3.bf16.msra.mxu0 %v4113_v35  ;;  %3355 = vmatprep.mubr.msk.bf16.mxu1 %vm4582_vm9, %v347_v42  ;;  %v246_v48 = vadd.f32 %v4529_v55, %v245_v45  ;;  %v309_v50 = vshrl.u32 %v304_v46, 16  ;;  %v312_v60 = vshll.u32 %v304_v46, 16  ;;  %v4128_v35 = vld [vmem:[%s5443_s3 + $0x110] sm:$0xff]   ;;  %v4131_v40 = vld [vmem:[%s5443_s3 + $0x1e8] sm:$0xff]   ;;  %v4132_v42 = vld [vmem:[%s5443_s3 + $0x118] sm:$0xff]  }
 0x10a   :  { %v284_v56 = vmax.f32 %v254_v44, 0.0  ;;  %3662 = vmatprep.subr.bf16.mxu0 %v4115_v39  ;;  %v4134_v46 = vld [vmem:[%s5443_s3 + $0x160] sm:$0xff]  }
 0x10b   :  { %v282_v58 = vmax.f32 %v246_v48, 0.0  ;;  %v311_v59 = vrot.slane %v309_v50, 7  ;;  %v376_v48 = vshrl.u32 %v4573_v30, 16 }
 0x10c   :  { %v4609_v61 = vpack.c.bf16 %v284_v56, %v283_v43  ;;  %v4133_v43 = vld [vmem:[%s5443_s3 + $0x1a8] sm:$0xff]   ;;  %v4137_v56 = vld [vmem:[%s5443_s3 + $0x1b0] sm:$0xff]  }
 0x10d   :  { %v4611_v62 = vpack.c.bf16 %v282_v58, %v281_v47  ;;  %3663 = vmatpush3.bf16.msra.mxu0 %v4117_v49  ;;  %v3981_v63 = vpop.f32.mrb[12].mxu0  ;;  %v314_v0 = vor.u32 %v312_v60, %v311_v59  ;;  %v4135_v47 = vld [vmem:[%s5443_s3 + $0x1f0] sm:$0xff]   ;;  %v378_v58 = vrot.slane %v376_v48, 7  ;;  %v4139_v60 = vld [vmem:[%s5443_s3 + $0x1f8] sm:$0xff]  }
 0x10e   :  { %v363_v3 = vshrl.u32 %v4609_v61, 16  ;;  %v267_v5 = vadd.f32 %v3981_v63, %v4529_v55  ;;  %v258_v6 = vpop.f32.mrb[13].mxu0  ;;  %3664 = vmatprep.subr.bf16.mxu0 %v4119_v57  ;;  %v366_v11 = vshll.u32 %v4609_v61, 16  ;;  %v4138_v57 = vld [vmem:[%s5443_s3 + $0x168] sm:$0xff]   ;;  %v379_v63 = vshll.u32 %v4573_v30, 16  ;;  %v4179_v48 = vld [vmem:[%s5445_s5 + $0xf0] sm:$0xff]  }
 0x10f   :  { %v259_v12 = vadd.f32 %v4529_v55, %v258_v6  ;;  %v3982_v13 = vpop.f32.mrb[14].mxu0  ;;  %v326_v14 = vsel %vm4565_vm6, 0, %v314_v0  ;;  %v4140_v0 = vld [vmem:[%s5443_s3 + $0x128] sm:$0xff]   ;;  %v4143_v6 = vld [vmem:[%s5443_s3 + $0x130] sm:$0xff]  }
 0x110   :  { %v287_v15 = vmax.f32 %v267_v5, 0.0  ;;  %v270_v16 = vadd.f32 %v3982_v13, %v4529_v55  ;;  %3356 = vmatmul.mubr.msk.bf16.vlgmr.msra.gmra.mrb[0].mxu1 %vm4569_vm7, %v326_v14  ;;  %v261_v17 = vpop.f32.mrb[15].mxu0  ;;  %v365_v18 = vrot.slane %v363_v3, 7  ;;  %v381_v3 = vor.u32 %v379_v63, %v378_v58  ;;  %v4146_v13 = vld [vmem:[%s5443_s3 + $0x200] sm:$0xff]   ;;  %v4185_v58 = vld [vmem:[%s5445_s5 + $0xb8] sm:$0xff]  }
 0x111   :  { %v285_v19 = vmax.f32 %v259_v12, 0.0  ;;  %3633 = vmatpush3.bf16.msra.mxu1 %v4120_v1  ;;  %3665 = vmatpush3.bf16.msra.mxu0 %v4121_v2  ;;  %v262_v22 = vadd.f32 %v4529_v55, %v261_v17  ;;  %v4141_v1 = vld [vmem:[%s5443_s3 + $0x1b8] sm:$0xff]   ;;  %v4142_v2 = vld [vmem:[%s5443_s3 + $0x170] sm:$0xff]  }
 0x112   :  { %v288_v25 = vmax.f32 %v270_v16, 0.0  ;;  %3634 = vmatprep.subr.bf16.mxu1 %v4122_v7  ;;  %3666 = vmatprep.subr.bf16.mxu0 %v4123_v8  ;;  %v368_v26 = vor.u32 %v366_v11, %v365_v18  ;;  %v391_v7 = vsel %vm4565_vm6, 0, %v381_v3  ;;  %v4145_v12 = vld [vmem:[%s5443_s3 + $0x138] sm:$0xff]   ;;  %v4148_v17 = vld [vmem:[%s5443_s3 + $0x210] sm:$0xff]  }
 0x113   :  { %v286_v28 = vmax.f32 %v262_v22, 0.0  ;;  %v4149_v18 = vld [vmem:[%s5443_s3 + $0x218] sm:$0xff]   ;;  %v4157_v22 = vld [vmem:[%s5445_s5 + $0x80] sm:$0xff]  }
 0x114   :  { %v4647_v31 = vpack.c.bf16 %v288_v25, %v287_v15  ;;  %v372_v33 = vsel %vm4565_vm6, 0, %v368_v26  ;;  %v4147_v15 = vld [vmem:[%s5443_s3 + $0x208] sm:$0xff]  }
 0x115   :  { %3635 = vmatpush3.bf16.msra.mxu1 %v4124_v20  ;;  %3667 = vmatpush3.bf16.msra.mxu0 %v4125_v21  ;;  %v295_v55 = vpack.c.bf16 %v286_v28, %v285_v19  ;;  %v4154_v19 = vld [vmem:[%s5445_s5 + $0x40] sm:$0xff]   ;;  %v4158_v25 = vld [vmem:[%s5445_s5 + $0x48] sm:$0xff]  }
 0x116   :  { %3363 = vmatprep.mubr.msk.bf16.mxu0 %vm4569_vm7, %v372_v33  ;;  %3636 = vmatprep.subr.bf16.mxu1 %v4126_v27  ;;  %v300_v37 = vrot.slane %v4647_v31, 6  ;;  %v383_v5 = vshrl.u32 %v4647_v31, 16  ;;  %v386_v11 = vshll.u32 %v4647_v31, 16  ;;  %v4155_v20 = vld [vmem:[%s5445_s5 + $0xc0] sm:$0xff]   ;;  %v4159_v26 = vld [vmem:[%s5445_s5 + $0xc8] sm:$0xff]   ;;  %v4164_v33 = vld [vmem:[%s5445_s5 + $0x10] sm:$0xff]  }
 0x117   :  { %v348_v39 = vrot.slane %v295_v55, 6  ;;  %3668 = vmatprep.subr.bf16.mxu0 %v4127_v29  ;;  %v4156_v21 = vld [vmem:[%s5445_s5] sm:$0xff]   ;;  %v4160_v27 = vld [vmem:[%s5445_s5 + $0x8] sm:$0xff]   ;;  %v4162_v29 = vld [vmem:[%s5445_s5 + $0x50] sm:$0xff]  }
 0x118   :  { %3365 = vmatmul.mubr.msk.bf16.gmra.mrb[20].mxu0 %vm4582_vm9, %v300_v37  ;;  %v307_v41 = vsel %vm301_vm8, 0, %v300_v37  ;;  %v385_v8 = vrot.slane %v383_v5, 7  ;;  %v4161_v28 = vld [vmem:[%s5445_s5 + $0x88] sm:$0xff]   ;;  %v4168_v37 = vld [vmem:[%s5445_s5 + $0x18] sm:$0xff]  }
 0x119   :  { %3637 = vmatpush3.bf16.msra.mxu1 %v4128_v35  ;;  %3669 = vmatpush3.bf16.msra.mxu0 %v4129_v36  ;;  %v315_v44 = vshrl.u32 %v307_v41, 16  ;;  %v318_v45 = vshll.u32 %v307_v41, 16  ;;  %v4166_v35 = vld [vmem:[%s5445_s5 + $0x58] sm:$0xff]   ;;  %v4172_v41 = vld [vmem:[%s5445_s5 + $0x20] sm:$0xff]  }
 0x11a   :  { %1157 = vmatprep.mubr.bf16.mxu0 %v4577_v32  ;;  %3638 = vmatprep.subr.bf16.mxu1 %v4130_v38  ;;  %v4136_v32 = vld [vmem:[%s5443_s3 + $0x120] sm:$0xff]   ;;  %v388_v14 = vor.u32 %v386_v11, %v385_v8  ;;  %v4167_v36 = vld [vmem:[%s5445_s5 + $0xd8] sm:$0xff]  }
 0x11b   :  { %3670 = vmatprep.subr.bf16.mxu0 %v4131_v40  ;;  %3358 = vmatprep.mubr.msk.bf16.mxu1 %vm4582_vm9, %v348_v39  ;;  %v317_v49 = vrot.slane %v315_v44, 7  ;;  %v4169_v38 = vld [vmem:[%s5445_s5 + $0x98] sm:$0xff]   ;;  %v4170_v39 = vld [vmem:[%s5445_s5 + $0x60] sm:$0xff]   ;;  %v4175_v44 = vld [vmem:[%s5445_s5 + $0xe8] sm:$0xff]  }
 0x11c   :  { %v392_v16 = vsel %vm4565_vm6, 0, %v388_v14  ;;  %v4171_v40 = vld [vmem:[%s5445_s5 + $0xe0] sm:$0xff]  }
 0x11d   :  { %3639 = vmatpush3.bf16.msra.mxu1 %v4132_v42  ;;  %3671 = vmatpush3.bf16.msra.mxu0 %v4133_v43  ;;  %v320_v50 = vor.u32 %v318_v45, %v317_v49  ;;  %v4173_v42 = vld [vmem:[%s5445_s5 + $0xa0] sm:$0xff]   ;;  %v4174_v43 = vld [vmem:[%s5445_s5 + $0x68] sm:$0xff]   ;;  %v4180_v49 = vld [vmem:[%s5445_s5 + $0x30] sm:$0xff]  }
 0x11e   :  { %3640 = vmatprep.subr.bf16.mxu1 %v4134_v46  ;;  %3672 = vmatprep.subr.bf16.mxu0 %v4135_v47  ;;  %v4176_v45 = vld [vmem:[%s5445_s5 + $0x28] sm:$0xff]   ;;  %v4178_v47 = vld [vmem:[%s5445_s5 + $0x70] sm:$0xff]  }
 0x11f   :  { %v327_v59 = vsel %vm4565_vm6, 0, %v320_v50  ;;  %v4177_v46 = vld [vmem:[%s5445_s5 + $0xa8] sm:$0xff]   ;;  %v4181_v50 = vld [vmem:[%s5445_s5 + $0xb0] sm:$0xff]  }
 0x120   :  { %3359 = vmatmul.mubr.msk.bf16.gmra.mrb[4].mxu1 %vm4569_vm7, %v327_v59  ;;  %v4186_v59 = vld [vmem:[%s5445_s5 + $0x140] sm:$0xff]  }
 0x121   :  { %3641 = vmatpush3.bf16.msra.mxu1 %v4136_v32  ;;  %3673 = vmatpush3.bf16.msra.mxu0 %v4137_v56  ;;  %v4182_v32 = vld [vmem:[%s5445_s5 + $0x78] sm:$0xff]  }
 0x122   :  { %1108 = vmatprep.mubr.bf16.mxu1 %v4555_v9  ;;  %3642 = vmatprep.subr.bf16.mxu1 %v4138_v57  ;;  %v4144_v9 = vld [vmem:[%s5443_s3 + $0x178] sm:$0xff]  }
 0x123   :  { %3674 = vmatprep.subr.bf16.mxu0 %v4139_v60  ;;  %v4183_v56 = vld [vmem:[%s5445_s5 + $0xf8] sm:$0xff]   ;;  %v4187_v60 = vld [vmem:[%s5445_s5 + $0x1c0] sm:$0xff]  }
 0x124   :  { %v4184_v57 = vld [vmem:[%s5445_s5 + $0x38] sm:$0xff]  }
 0x125   :  { %3643 = vmatpush3.bf16.msra.mxu1 %v4140_v0  ;;  %3675 = vmatpush3.bf16.msra.mxu0 %v4141_v1 }
 0x126   :  { %3644 = vmatprep.subr.bf16.mxu1 %v4142_v2  ;;  %3698 = vmatprep.subr.bf16.mxu0 %v4154_v19 }
 0x128   :  { %3366 = vmatmul.mubr.msk.bf16.vlgmr.msra.gmra.mrb[24].mxu0 %vm4569_vm7, %v391_v7 }
 0x129   :  { %3645 = vmatpush3.bf16.msra.mxu1 %v4143_v6  ;;  %1165 = vmatprep.mubr.bf16.mxu0 %v295_v55  ;;  %v4165_v55 = vld [vmem:[%s5445_s5 + $0x90] sm:$0xff]  }
 0x12a   :  { %3646 = vmatprep.subr.bf16.mxu1 %v4144_v9  ;;  %3699 = vmatpush3.bf16.msra.mxu0 %v4156_v21  ;;  %v3281_v9 = vld [vmem:[%s5446_s4] ss:$0 sm:$0xff] }
 0x12b   :  { %3700 = vmatprep.subr.bf16.mxu0 %v4158_v25 }
 0x12d   :  { %3647 = vmatpush3.bf16.msra.mxu1 %v4145_v12 }
 0x12e   :  { %3983 = vmatprep.subr.bf16.mxu1 %v4146_v13  ;;  %3701 = vmatpush3.bf16.msra.mxu0 %v4160_v27 }
 0x12f   :  { %3702 = vmatprep.subr.bf16.mxu0 %v4162_v29 }
 0x130   :  { %1109 = vmatmul.mubr.bf16.vlgmr.msra.gmra.mrb[8].mxu1 %v4557_v10  ;;  %3367 = vmatmul.mubr.msk.bf16.gmra.mrb[28].mxu0 %vm4569_vm7, %v392_v16  ;;  %v4150_v10 = vld [vmem:[%s5443_s3 + $0x220] sm:$0xff]  }
 0x131   :  { %1116 = vmatprep.mubr.bf16.mxu1 %v4609_v61  ;;  %3984 = vmatpush3.bf16.msra.mxu1 %v4146_v13  ;;  %v4151_v61 = vld [vmem:[%s5443_s3 + $0x228] sm:$0xff]  }
 0x132   :  { %3985 = vmatprep.subr.bf16.mxu1 %v4147_v15  ;;  %3703 = vmatpush3.bf16.msra.mxu0 %v4164_v33 }
 0x133   :  { %3704 = vmatprep.subr.bf16.mxu0 %v4166_v35 }
 0x135   :  { %3986 = vmatpush3.bf16.msra.mxu1 %v4147_v15 }
 0x136   :  { %3987 = vmatprep.subr.bf16.mxu1 %v4148_v17  ;;  %3705 = vmatpush3.bf16.msra.mxu0 %v4168_v37 }
 0x137   :  { %3706 = vmatprep.subr.bf16.mxu0 %v4170_v39 }
 0x138   :  { %1117 = vmatmul.mubr.bf16.gmra.mrb[12].mxu1 %v4611_v62  ;;  %v4152_v62 = vld [vmem:[%s5443_s3 + $0x230] sm:$0xff]  }
 0x139   :  { %3988 = vmatpush3.bf16.msra.mxu1 %v4148_v17  ;;  %3999 = vmatprep.mubr.bf16.mxu1 %v4573_v30  ;;  %v4153_v30 = vld [vmem:[%s5443_s3 + $0x238] sm:$0xff]  }
 0x13a   :  { %3989 = vmatprep.subr.bf16.mxu1 %v4149_v18  ;;  %3707 = vmatpush3.bf16.msra.mxu0 %v4172_v41 }
 0x13b   :  { %3708 = vmatprep.subr.bf16.mxu0 %v4174_v43 }
 0x13d   :  { %3990 = vmatpush3.bf16.msra.mxu1 %v4149_v18 }
 0x13e   :  { %3991 = vmatprep.subr.bf16.mxu1 %v4150_v10  ;;  %3709 = vmatpush3.bf16.msra.mxu0 %v4176_v45 }
 0x13f   :  { %3710 = vmatprep.subr.bf16.mxu0 %v4178_v47 }
 0x141   :  { %3992 = vmatpush3.bf16.msra.mxu1 %v4150_v10 }
 0x142   :  { %3993 = vmatprep.subr.bf16.mxu1 %v4151_v61  ;;  %3711 = vmatpush3.bf16.msra.mxu0 %v4180_v49 }
 0x143   :  { %3712 = vmatprep.subr.bf16.mxu0 %v4182_v32 }
 0x145   :  { %3994 = vmatpush3.bf16.msra.mxu1 %v4151_v61 }
 0x146   :  { %3995 = vmatprep.subr.bf16.mxu1 %v4152_v62  ;;  %3713 = vmatpush3.bf16.msra.mxu0 %v4184_v57 }
 0x147   :  { %3754 = vmatprep.subr.bf16.mxu0 %v4186_v59 }
 0x149   :  { %3996 = vmatpush3.bf16.msra.mxu1 %v4152_v62 }
 0x14a   :  { %3997 = vmatprep.subr.bf16.mxu1 %v4153_v30 }
 0x14d   :  { %3998 = vmatpush3.bf16.msra.mxu1 %v4153_v30 }
 0x14e   :  { %3726 = vmatprep.subr.bf16.mxu1 %v4155_v20 }
 0x150   :  { %4000 = vmatmul.mubr.bf16.vlgmr.msra.gmra.mrb[16].mxu1 %v4647_v31  ;;  %v4163_v31 = vld [vmem:[%s5445_s5 + $0xd0] sm:$0xff]  }
 0x151   :  { %3727 = vmatpush3.bf16.msra.mxu1 %v4157_v22 }
 0x152   :  { %3728 = vmatprep.subr.bf16.mxu1 %v4159_v26 }
 0x155   :  { %3729 = vmatpush3.bf16.msra.mxu1 %v4161_v28 }
 0x156   :  { %3730 = vmatprep.subr.bf16.mxu1 %v4163_v31 }
 0x159   :  { %3731 = vmatpush3.bf16.msra.mxu1 %v4165_v55 }
 0x15a   :  { %3732 = vmatprep.subr.bf16.mxu1 %v4167_v36 }
 0x15d   :  { %3733 = vmatpush3.bf16.msra.mxu1 %v4169_v38 }
 0x15e   :  { %3734 = vmatprep.subr.bf16.mxu1 %v4171_v40 }
 0x161   :  { %3735 = vmatpush3.bf16.msra.mxu1 %v4173_v42 }
 0x162   :  { %3736 = vmatprep.subr.bf16.mxu1 %v4175_v44 }
 0x165   :  { %3737 = vmatpush3.bf16.msra.mxu1 %v4177_v46 }
 0x166   :  { %3738 = vmatprep.subr.bf16.mxu1 %v4179_v48 }
 0x169   :  { %3739 = vmatpush3.bf16.msra.mxu1 %v4181_v50 }
 0x16a   :  { %3740 = vmatprep.subr.bf16.mxu1 %v4183_v56 }
 0x16d   :  { %3741 = vmatpush3.bf16.msra.mxu1 %v4185_v58 }
 0x16e   :  { %3782 = vmatprep.subr.bf16.mxu1 %v4187_v60 }
 0x1db   :  { %v3620_v63 = vpop.f32.mrb[16].mxu0 }
 0x1dc   :  { %v3621_v0 = vpop.f32.mrb[17].mxu0 }
 0x1dd   :  { %v3622_v1 = vadd.f32 %v3621_v0, %v3620_v63  ;;  %v3623_v2 = vpop.f32.mrb[18].mxu0 }
 0x1de   :  { %v3624_v3 = vpop.f32.mrb[19].mxu0 }
 0x1df   :  { %v3625_v5 = vadd.f32 %v3624_v3, %v3623_v2 }
 0x1e3   :  { %v3592_v6 = vpop.f32.mrb[0].mxu1 }
 0x1e4   :  { %v3593_v7 = vpop.f32.mrb[1].mxu1 }
 0x1e5   :  { %v3594_v8 = vadd.f32 %v3593_v7, %v3592_v6  ;;  %v3595_v11 = vpop.f32.mrb[2].mxu1 }
 0x1e6   :  { %v3596_v12 = vpop.f32.mrb[3].mxu1 }
 0x1e7   :  { %v1013_v13 = vadd.f32 %v3594_v8, %v3281_v9  ;;  %v3597_v14 = vadd.f32 %v3596_v12, %v3595_v11 }
 0x1e9   :  { %v1016_v15 = vadd.f32 %v3597_v14, %v3281_v9  ;;  %v1062_v16 = vadd.f32 %v3622_v1, %v1013_v13 }
 0x1eb   :  { %v3626_v17 = vpop.f32.mrb[20].mxu0  ;;  %v1065_v18 = vadd.f32 %v3625_v5, %v1016_v15 }
 0x1ec   :  { %v3627_v10 = vpop.f32.mrb[21].mxu0 }
 0x1ed   :  { %v3628_v61 = vadd.f32 %v3627_v10, %v3626_v17  ;;  %v3629_v62 = vpop.f32.mrb[22].mxu0 }
 0x1ee   :  { %v3630_v30 = vpop.f32.mrb[23].mxu0 }
 0x1ef   :  { %v3631_v19 = vadd.f32 %v3630_v30, %v3629_v62 }
 0x1f3   :  { %v3598_v20 = vpop.f32.mrb[4].mxu1 }
 0x1f4   :  { %v3599_v21 = vpop.f32.mrb[5].mxu1 }
 0x1f5   :  { %v3600_v22 = vadd.f32 %v3599_v21, %v3598_v20  ;;  %v3601_v25 = vpop.f32.mrb[6].mxu1  ;;  %v1272_v21 = vsel %vm1270_vm12, 65537, %v4306_v4 }
 0x1f6   :  { %v3602_v26 = vpop.f32.mrb[7].mxu1 }
 0x1f7   :  { %v1021_v27 = vadd.f32 %v3600_v22, %v3281_v9  ;;  %v3603_v28 = vadd.f32 %v3602_v26, %v3601_v25  ;;  %v1273_v22 = vsel %vm1271_vm13, 65537, %v4306_v4 }
 0x1f9   :  { %v1024_v29 = vadd.f32 %v3603_v28, %v3281_v9  ;;  %v1070_v31 = vadd.f32 %v3628_v61, %v1021_v27 }
 0x1fb   :  { %v3676_v33 = vpop.f32.mrb[24].mxu0  ;;  %v1073_v55 = vadd.f32 %v3631_v19, %v1024_v29 }
 0x1fc   :  { %v3677_v35 = vpop.f32.mrb[25].mxu0 }
 0x1fd   :  { %v3678_v36 = vadd.f32 %v3677_v35, %v3676_v33  ;;  %v3679_v37 = vpop.f32.mrb[26].mxu0  ;;  %v3368_v33 = vcombine.low %v1272_v21, %v1273_v22  ;;  %v4203_v21 = vld [vmem:[%s5445_s5 + $0x1e0] sm:$0xff]  }
 0x1fe   :  { %v3680_v38 = vpop.f32.mrb[27].mxu0  ;;  %v4204_v22 = vld [vmem:[%s5445_s5 + $0x120] sm:$0xff]  }
 0x1ff   :  { %v3681_v39 = vadd.f32 %v3680_v38, %v3679_v37  ;;  %vm4918_vm0 = vcmp.ne.s16.totalorder %v3368_v33, 0  ;;  %v4210_v33 = vld [vmem:[%s5445_s5 + $0x170] sm:$0xff]  }
 0x203   :  { %v3648_v40 = vpop.f32.mrb[8].mxu1  ;;  %v3682_v41 = vpop.f32.mrb[28].mxu0 }
 0x204   :  { %v3649_v42 = vpop.f32.mrb[9].mxu1  ;;  %v3683_v43 = vpop.f32.mrb[29].mxu0 }
 0x205   :  { %v3650_v44 = vadd.f32 %v3649_v42, %v3648_v40  ;;  %v3684_v45 = vadd.f32 %v3683_v43, %v3682_v41  ;;  %v3651_v46 = vpop.f32.mrb[10].mxu1  ;;  %v3685_v47 = vpop.f32.mrb[30].mxu0  ;;  %v4301_v43 = vld [vmem:[%s5449_s9 + $0x18] sm:$0xff]  }
 0x206   :  { %v3652_v48 = vpop.f32.mrb[11].mxu1  ;;  %v3686_v49 = vpop.f32.mrb[31].mxu0 }
 0x207   :  { %v1111_v50 = vadd.f32 %v3650_v44, %v1062_v16  ;;  %v3653_v32 = vadd.f32 %v3652_v48, %v3651_v46  ;;  %v3687_v56 = vadd.f32 %v3686_v49, %v3685_v47  ;;  %v4188_v44 = vld [vmem:[%s5445_s5 + $0x100] sm:$0xff]   ;;  %v4300_v47 = vld [vmem:[%s5449_s9 + $0x10] sm:$0xff]  }
 0x209   :  { %v1114_v57 = vadd.f32 %v3653_v32, %v1065_v18  ;;  %v1160_v58 = vadd.f32 %v3678_v36, %v1111_v50  ;;  %v4190_v50 = vld [vmem:[%s5445_s5 + $0x148] sm:$0xff]  }
 0x20a   :  { %v4191_v32 = vld [vmem:[%s5445_s5 + $0x1c8] sm:$0xff]  }
 0x20b   :  { %v3654_v59 = vpop.f32.mrb[12].mxu1  ;;  %v1163_v60 = vadd.f32 %v3681_v39, %v1114_v57 }
 0x20c   :  { %v3655_v63 = vpop.f32.mrb[13].mxu1 }
 0x20d   :  { %v3656_v0 = vadd.f32 %v3655_v63, %v3654_v59  ;;  %v3657_v1 = vpop.f32.mrb[14].mxu1  ;;  %v4192_v59 = vld [vmem:[%s5445_s5 + $0x108] sm:$0xff]  }
 0x20e   :  { %v3658_v2 = vpop.f32.mrb[15].mxu1 }
 0x20f   :  { %v1119_v3 = vadd.f32 %v3656_v0, %v1070_v31  ;;  %v3659_v5 = vadd.f32 %v3658_v2, %v3657_v1  ;;  %v4194_v0 = vld [vmem:[%s5445_s5 + $0x150] sm:$0xff]  }
 0x210   :  { %v4195_v1 = vld [vmem:[%s5445_s5 + $0x1d0] sm:$0xff]  }
 0x211   :  { %v1122_v6 = vadd.f32 %v3659_v5, %v1073_v55  ;;  %v1168_v9 = vadd.f32 %v3684_v45, %v1119_v3  ;;  %v4189_v45 = vld [vmem:[%s5445_s5 + $0x180] sm:$0xff]   ;;  %v4196_v5 = vld [vmem:[%s5445_s5 + $0x110] sm:$0xff]  }
 0x213   :  { %v1171_v7 = vadd.f32 %v3687_v56, %v1122_v6  ;;  %v4197_v6 = vld [vmem:[%s5445_s5 + $0x190] sm:$0xff]  }
 0x223   :  { %v4001_v8 = vpop.f32.mrb[16].mxu1 }
 0x224   :  { %v4865_v11 = vadd.f32 %v4001_v8, %v1168_v9  ;;  %v1208_v12 = vpop.f32.mrb[17].mxu1 }
 0x225   :  { %v4867_v13 = vadd.f32 %v1208_v12, %v1160_v58  ;;  %v4002_v14 = vpop.f32.mrb[18].mxu1  ;;  %v4198_v12 = vld [vmem:[%s5445_s5 + $0x158] sm:$0xff]  }
 0x226   :  { %v4869_v15 = vadd.f32 %v4002_v14, %v1171_v7  ;;  %v1211_v16 = vpop.f32.mrb[19].mxu1  ;;  %v1225_v10 = vmax.f32 %v4865_v11, 0.0  ;;  %v4199_v14 = vld [vmem:[%s5445_s5 + $0x1d8] sm:$0xff]  }
 0x227   :  { %v4877_v18 = vadd.f32 %v1211_v16, %v1163_v60  ;;  %v1223_v62 = vmax.f32 %v4867_v13, 0.0  ;;  %v4193_v60 = vld [vmem:[%s5445_s5 + $0x188] sm:$0xff]  }
 0x228   :  { %v1226_v61 = vmax.f32 %v4869_v15, 0.0 }
 0x229   :  { %v1224_v30 = vmax.f32 %v4877_v18, 0.0 }
 0x22a   :  { %v4892_v51 = vpack.c.bf16 %v1226_v61, %v1225_v10 }
 0x22b   :  { %v4898_v52 = vpack.c.bf16 %v1224_v30, %v1223_v62 }
 0x22c   :  { %v1232_v53 = vrot.slane %v4892_v51, 6  ;;  %v1288_v54 = vshrl.u32 %v4892_v51, 16  ;;  %v1291_v4 = vshll.u32 %v4892_v51, 16 }
 0x22d   :  { %v1231_v19 = vrot.slane %v4898_v52, 6  ;;  %v1281_v20 = vshrl.u32 %v4898_v52, 16  ;;  %v1284_v27 = vshll.u32 %v4898_v52, 16  ;;  %v1310_v16 = vrot.slane %v4898_v52, 2 }
 0x22e   :  { %v1237_v28 = vsel %vm301_vm8, 0, %v1232_v53  ;;  %v1290_v55 = vrot.slane %v1288_v54, 7 }
 0x22f   :  { %v1234_v25 = vsel %vm301_vm8, 0, %v1231_v19  ;;  %3443 = vmatprep.mubr.msk.bf16.mxu0 %vm4582_vm9, %v1231_v19  ;;  %v1283_v26 = vrot.slane %v1281_v20, 7  ;;  %v1245_v38 = vshrl.u32 %v1237_v28, 16  ;;  %v1248_v39 = vshll.u32 %v1237_v28, 16  ;;  %v4201_v19 = vld [vmem:[%s5445_s5 + $0x198] sm:$0xff]  }
 0x230   :  { %v1239_v29 = vshrl.u32 %v1234_v25, 16  ;;  %v1242_v31 = vshll.u32 %v1234_v25, 16  ;;  %v1293_v46 = vor.u32 %v1291_v4, %v1290_v55  ;;  %v1300_v63 = vrot.slane %v1284_v27, 1  ;;  %v4205_v25 = vld [vmem:[%s5445_s5 + $0x1a0] sm:$0xff]   ;;  %v4211_v55 = vld [vmem:[%s5445_s5 + $0x1f0] sm:$0xff]  }
 0x231   :  { %v1286_v35 = vor.u32 %v1284_v27, %v1283_v26  ;;  %v1247_v56 = vrot.slane %v1245_v38, 7  ;;  %v1259_v57 = vrot.slane %v1248_v39, 1  ;;  %v4206_v26 = vld [vmem:[%s5445_s5 + $0x168] sm:$0xff]   ;;  %v1314_v28 = vsel %vm1312_vm2, %v1310_v16, 0 }
 0x232   :  { %v1241_v36 = vrot.slane %v1239_v29, 7  ;;  %v1257_v37 = vrot.slane %v1242_v31, 1  ;;  %v1297_v58 = vsel %vm4565_vm6, 0, %v1293_v46  ;;  %v1301_v9 = vor.u32 %v1300_v63, %v1281_v20  ;;  %v4202_v20 = vld [vmem:[%s5445_s5 + $0x160] sm:$0xff]   ;;  %v4207_v27 = vld [vmem:[%s5445_s5 + $0x1e8] sm:$0xff]   ;;  %v4216_v46 = vld [vmem:[%s5445_s5 + $0x138] sm:$0xff]  }
 0x233   :  { %v1296_v40 = vsel %vm4565_vm6, 0, %v1286_v35  ;;  %v1250_v2 = vor.u32 %v1248_v39, %v1247_v56  ;;  %v1260_v3 = vor.u32 %v1259_v57, %v1245_v38  ;;  %v1319_v35 = vshrl.u32 %v1314_v28, 16  ;;  %v4213_v38 = vld [vmem:[%s5445_s5 + $0x1b0] sm:$0xff]   ;;  %v4214_v39 = vld [vmem:[%s5445_s5 + $0x178] sm:$0xff]   ;;  %v4219_v57 = vld [vmem:[%s5445_s5 + $0x208] sm:$0xff]  }
 0x234   :  { %3448 = vmatprep.mubr.msk.bf16.mxu1 %vm4569_vm7, %v1296_v40  ;;  %v1244_v41 = vor.u32 %v1242_v31, %v1241_v36  ;;  %v1258_v42 = vor.u32 %v1257_v37, %v1239_v29  ;;  %v1306_v17 = vsel %vm4931_vm1, %v1301_v9, 0  ;;  %v4208_v29 = vld [vmem:[%s5445_s5 + $0x128] sm:$0xff]   ;;  %v1311_v36 = vrot.slane %v4892_v51, 2  ;;  %v4212_v37 = vld [vmem:[%s5445_s5 + $0x130] sm:$0xff]   ;;  %v4215_v40 = vld [vmem:[%s5445_s5 + $0x1f8] sm:$0xff]  }
 0x235   :  { %v1254_v7 = vsel %vm4565_vm6, 0, %v1250_v2  ;;  %v1267_v8 = vsel %vm4931_vm1, %v1260_v3, 0  ;;  %v4209_v31 = vld [vmem:[%s5445_s5 + $0x1a8] sm:$0xff]   ;;  %v4221_v2 = vld [vmem:[%s5445_s5 + $0x218] sm:$0xff]  }
 0x236   :  { %v1253_v48 = vsel %vm4565_vm6, 0, %v1244_v41  ;;  %v1266_v49 = vsel %vm4931_vm1, %v1258_v42, 0  ;;  %v1321_v41 = vrot.slane %v1319_v35, 7  ;;  %v1302_v42 = vrot.slane %v1291_v4, 1  ;;  %v4225_v9 = vld [vmem:[%s5445_s5 + $0x238] sm:$0xff]  }
 0x237   :  { %3444 = vmatmul.mubr.msk.bf16.vlgmr.msra.gmra.mrb[32].mxu0 %vm4569_vm7, %v1253_v48  ;;  %3449 = vmatmul.mubr.msk.bf16.vlgmr.msra.gmra.mrb[20].mxu1 %vm4918_vm0, %v1266_v49  ;;  %v4217_v48 = vld [vmem:[%s5445_s5 + $0x1b8] sm:$0xff]   ;;  %v4218_v49 = vld [vmem:[%s5445_s5 + $0x200] sm:$0xff]  }
 0x238   :  { %3755 = vmatpush3.bf16.msra.mxu0 %v4188_v44  ;;  %3783 = vmatpush3.bf16.msra.mxu1 %v4189_v45  ;;  %v1317_v44 = vsel %vm1312_vm2, %v1311_v36, 0  ;;  %v1322_v45 = vshll.u32 %v1314_v28, 16  ;;  %v4237_v28 = vld [vmem:[%s5447_s7 + $0x90] sm:$0xff]  }
 0x239   :  { %3446 = vmatprep.mubr.msk.bf16.mxu0 %vm4582_vm9, %v1232_v53  ;;  %3450 = vmatprep.mubr.msk.bf16.mxu1 %vm4569_vm7, %v1297_v58  ;;  %v4200_v53 = vld [vmem:[%s5445_s5 + $0x118] sm:$0xff]  }
 0x23a   :  { %3756 = vmatprep.subr.bf16.mxu0 %v4190_v50  ;;  %3784 = vmatprep.subr.bf16.mxu1 %v4191_v32  ;;  %v1324_v4 = vor.u32 %v1322_v45, %v1321_v41  ;;  %v1325_v50 = vshrl.u32 %v1317_v44, 16  ;;  %v1303_v32 = vor.u32 %v1302_v42, %v1288_v54  ;;  %v1337_v54 = vrot.slane %v1322_v45, 1  ;;  %v4248_v41 = vld [vmem:[%s5447_s7 + $0x28] sm:$0xff]   ;;  %v4251_v45 = vld [vmem:[%s5447_s7 + $0xf0] sm:$0xff]  }
 0x23b   :  { %v4249_v42 = vld [vmem:[%s5447_s7 + $0xa8] sm:$0xff]  }
 0x23c   :  { %3757 = vmatpush3.bf16.msra.mxu0 %v4192_v59  ;;  %3785 = vmatpush3.bf16.msra.mxu1 %v4193_v60  ;;  %v1333_v56 = vsel %vm4565_vm6, 0, %v1324_v4  ;;  %v1327_v58 = vrot.slane %v1325_v50, 7  ;;  %v1307_v59 = vsel %vm4931_vm1, %v1303_v32, 0  ;;  %v1328_v60 = vshll.u32 %v1317_v44, 16  ;;  %v4250_v44 = vld [vmem:[%s5447_s7 + $0x70] sm:$0xff]   ;;  %v4255_v4 = vld [vmem:[%s5447_s7 + $0xf8] sm:$0xff]  }
 0x23d   :  { %3758 = vmatprep.subr.bf16.mxu0 %v4194_v0  ;;  %3786 = vmatprep.subr.bf16.mxu1 %v4195_v1  ;;  %v1338_v0 = vor.u32 %v1337_v54, %v1319_v35  ;;  %v4242_v35 = vld [vmem:[%s5447_s7 + $0x60] sm:$0xff]   ;;  %v4257_v32 = vld [vmem:[%s5447_s7 + $0xb8] sm:$0xff]  }
 0x23e   :  { %v1330_v63 = vor.u32 %v1328_v60, %v1327_v58  ;;  %v3369_v54 = vld [vmem:[%s5448_s6] ss:$0 sm:$0xff] }
 0x23f   :  { %3447 = vmatmul.mubr.msk.bf16.gmra.mrb[36].mxu0 %vm4569_vm7, %v1254_v7  ;;  %3451 = vmatmul.mubr.msk.bf16.gmra.mrb[24].mxu1 %vm4918_vm0, %v1267_v8  ;;  %v1343_v3 = vsel %vm4931_vm1, %v1338_v0, 0  ;;  %v1339_v7 = vrot.slane %v1328_v60, 1 }
 0x240   :  { %3759 = vmatpush3.bf16.msra.mxu0 %v4196_v5  ;;  %3787 = vmatpush3.bf16.msra.mxu1 %v4197_v6  ;;  %v1334_v1 = vsel %vm4565_vm6, 0, %v1330_v63  ;;  %v4222_v5 = vld [vmem:[%s5445_s5 + $0x220] sm:$0xff]   ;;  %v4224_v6 = vld [vmem:[%s5445_s5 + $0x230] sm:$0xff]  }
 0x241   :  { %3452 = vmatprep.mubr.msk.bf16.mxu0 %vm4918_vm0, %v1306_v17  ;;  %3454 = vmatprep.mubr.msk.bf16.mxu1 %vm1312_vm2, %v1310_v16  ;;  %v1340_v8 = vor.u32 %v1339_v7, %v1325_v50  ;;  %v4227_v16 = vld [vmem:[%s5447_s7 + $0xc0] sm:$0xff]   ;;  %v4256_v50 = vld [vmem:[%s5447_s7 + $0x38] sm:$0xff]  }
 0x242   :  { %3760 = vmatprep.subr.bf16.mxu0 %v4198_v12  ;;  %3788 = vmatprep.subr.bf16.mxu1 %v4199_v14  ;;  %v4226_v14 = vld [vmem:[%s5447_s7 + $0x40] sm:$0xff]  }
 0x243   :  { %v1344_v12 = vsel %vm4931_vm1, %v1340_v8, 0  ;;  %v4228_v17 = vld [vmem:[%s5447_s7] sm:$0xff]  }
 0x244   :  { %3761 = vmatpush3.bf16.msra.mxu0 %v4200_v53  ;;  %3789 = vmatpush3.bf16.msra.mxu1 %v4201_v19  ;;  %v4229_v53 = vld [vmem:[%s5447_s7 + $0x80] sm:$0xff]   ;;  %v4230_v19 = vld [vmem:[%s5447_s7 + $0x48] sm:$0xff]  }
 0x245   :  { %3762 = vmatprep.subr.bf16.mxu0 %v4202_v20  ;;  %3790 = vmatprep.subr.bf16.mxu1 %v4203_v21  ;;  %v4231_v20 = vld [vmem:[%s5447_s7 + $0xc8] sm:$0xff]  }
 0x246   :  { %v4232_v21 = vld [vmem:[%s5447_s7 + $0x8] sm:$0xff]  }
 0x248   :  { %3763 = vmatpush3.bf16.msra.mxu0 %v4204_v22  ;;  %3791 = vmatpush3.bf16.msra.mxu1 %v4205_v25  ;;  %v4233_v22 = vld [vmem:[%s5447_s7 + $0x88] sm:$0xff]   ;;  %v4234_v25 = vld [vmem:[%s5447_s7 + $0x50] sm:$0xff]  }
 0x249   :  { %3764 = vmatprep.subr.bf16.mxu0 %v4206_v26  ;;  %3792 = vmatprep.subr.bf16.mxu1 %v4207_v27  ;;  %v4235_v26 = vld [vmem:[%s5447_s7 + $0xd0] sm:$0xff]  }
 0x24a   :  { %v4236_v27 = vld [vmem:[%s5447_s7 + $0x10] sm:$0xff]  }
 0x24c   :  { %3765 = vmatpush3.bf16.msra.mxu0 %v4208_v29  ;;  %3793 = vmatpush3.bf16.msra.mxu1 %v4209_v31  ;;  %v4238_v29 = vld [vmem:[%s5447_s7 + $0x58] sm:$0xff]  }
 0x24d   :  { %3766 = vmatprep.subr.bf16.mxu0 %v4210_v33  ;;  %3794 = vmatprep.subr.bf16.mxu1 %v4211_v55  ;;  %v4239_v31 = vld [vmem:[%s5447_s7 + $0xd8] sm:$0xff]  }
 0x24e   :  { %v4240_v33 = vld [vmem:[%s5447_s7 + $0x18] sm:$0xff]  }
 0x24f   :  { %v4241_v55 = vld [vmem:[%s5447_s7 + $0x98] sm:$0xff]  }
 0x250   :  { %3767 = vmatpush3.bf16.msra.mxu0 %v4212_v37  ;;  %3795 = vmatpush3.bf16.msra.mxu1 %v4213_v38  ;;  %v4244_v37 = vld [vmem:[%s5447_s7 + $0x20] sm:$0xff]  }
 0x251   :  { %3768 = vmatprep.subr.bf16.mxu0 %v4214_v39  ;;  %3796 = vmatprep.subr.bf16.mxu1 %v4215_v40  ;;  %v4245_v38 = vld [vmem:[%s5447_s7 + $0xa0] sm:$0xff]   ;;  %v4246_v39 = vld [vmem:[%s5447_s7 + $0x68] sm:$0xff]  }
 0x252   :  { %v4247_v40 = vld [vmem:[%s5447_s7 + $0xe8] sm:$0xff]  }
 0x254   :  { %3769 = vmatpush3.bf16.msra.mxu0 %v4216_v46  ;;  %3797 = vmatpush3.bf16.msra.mxu1 %v4217_v48  ;;  %v4252_v46 = vld [vmem:[%s5447_s7 + $0x30] sm:$0xff]  }
 0x255   :  { %4003 = vmatprep.subr.bf16.mxu0 %v4218_v49  ;;  %3820 = vmatprep.subr.bf16.mxu1 %v4226_v14  ;;  %v4253_v48 = vld [vmem:[%s5447_s7 + $0xb0] sm:$0xff]  }
 0x257   :  { %2061 = vmatmul.mubr.bf16.vlgmr.msra.gmra.mrb[40].mxu0 %v4898_v52  ;;  %3455 = vmatmul.mubr.msk.bf16.vlgmr.msra.gmra.mrb[28].mxu1 %vm4569_vm7, %v1333_v56  ;;  %v4220_v52 = vld [vmem:[%s5445_s5 + $0x210] sm:$0xff]   ;;  %v4258_v56 = vld [vmem:[%s5447_s7 + $0x140] sm:$0xff]  }
 0x258   :  { %3453 = vmatprep.mubr.msk.bf16.mxu0 %vm4918_vm0, %v1307_v59  ;;  %3456 = vmatprep.mubr.msk.bf16.mxu1 %vm1312_vm2, %v1311_v36  ;;  %v4243_v36 = vld [vmem:[%s5447_s7 + $0xe0] sm:$0xff]  }
 0x259   :  { %4004 = vmatpush3.bf16.msra.mxu0 %v4218_v49  ;;  %3821 = vmatpush3.bf16.msra.mxu1 %v4228_v17  ;;  %v4254_v49 = vld [vmem:[%s5447_s7 + $0x78] sm:$0xff]  }
 0x25a   :  { %4005 = vmatprep.subr.bf16.mxu0 %v4219_v57  ;;  %3822 = vmatprep.subr.bf16.mxu1 %v4230_v19 }
 0x25d   :  { %4006 = vmatpush3.bf16.msra.mxu0 %v4219_v57  ;;  %3823 = vmatpush3.bf16.msra.mxu1 %v4232_v21  ;;  %v4259_v57 = vld [vmem:[%s5447_s7 + $0x1c0] sm:$0xff]  }
 0x25e   :  { %4007 = vmatprep.subr.bf16.mxu0 %v4220_v52  ;;  %3824 = vmatprep.subr.bf16.mxu1 %v4234_v25 }
 0x25f   :  { %2069 = vmatmul.mubr.bf16.gmra.mrb[44].mxu0 %v4892_v51  ;;  %3457 = vmatmul.mubr.msk.bf16.gmra.mrb[32].mxu1 %vm4569_vm7, %v1334_v1  ;;  %v4223_v51 = vld [vmem:[%s5445_s5 + $0x228] sm:$0xff]  }
 0x260   :  { %4019 = vmatprep.mubr.msk.bf16.mxu0 %vm4918_vm0, %v1343_v3 }
 0x261   :  { %4008 = vmatpush3.bf16.msra.mxu0 %v4220_v52  ;;  %3825 = vmatpush3.bf16.msra.mxu1 %v4236_v27 }
 0x262   :  { %4009 = vmatprep.subr.bf16.mxu0 %v4221_v2  ;;  %3826 = vmatprep.subr.bf16.mxu1 %v4238_v29 }
 0x265   :  { %4010 = vmatpush3.bf16.msra.mxu0 %v4221_v2  ;;  %3827 = vmatpush3.bf16.msra.mxu1 %v4240_v33 }
 0x266   :  { %4011 = vmatprep.subr.bf16.mxu0 %v4222_v5  ;;  %3828 = vmatprep.subr.bf16.mxu1 %v4242_v35 }
 0x269   :  { %4012 = vmatpush3.bf16.msra.mxu0 %v4222_v5  ;;  %3829 = vmatpush3.bf16.msra.mxu1 %v4244_v37 }
 0x26a   :  { %4013 = vmatprep.subr.bf16.mxu0 %v4223_v51  ;;  %3830 = vmatprep.subr.bf16.mxu1 %v4246_v39 }
 0x26d   :  { %4014 = vmatpush3.bf16.msra.mxu0 %v4223_v51  ;;  %3831 = vmatpush3.bf16.msra.mxu1 %v4248_v41 }
 0x26e   :  { %4015 = vmatprep.subr.bf16.mxu0 %v4224_v6  ;;  %3832 = vmatprep.subr.bf16.mxu1 %v4250_v44 }
 0x271   :  { %4016 = vmatpush3.bf16.msra.mxu0 %v4224_v6  ;;  %3833 = vmatpush3.bf16.msra.mxu1 %v4252_v46 }
 0x272   :  { %4017 = vmatprep.subr.bf16.mxu0 %v4225_v9  ;;  %3834 = vmatprep.subr.bf16.mxu1 %v4254_v49 }
 0x275   :  { %4018 = vmatpush3.bf16.msra.mxu0 %v4225_v9  ;;  %3835 = vmatpush3.bf16.msra.mxu1 %v4256_v50 }
 0x276   :  { %3848 = vmatprep.subr.bf16.mxu0 %v4227_v16  ;;  %3876 = vmatprep.subr.bf16.mxu1 %v4258_v56 }
 0x278   :  { %4020 = vmatmul.mubr.msk.bf16.vlgmr.msra.gmra.mrb[48].mxu0 %vm4918_vm0, %v1344_v12 }
 0x279   :  { %3849 = vmatpush3.bf16.msra.mxu0 %v4229_v53 }
 0x27a   :  { %3850 = vmatprep.subr.bf16.mxu0 %v4231_v20 }
 0x27d   :  { %3851 = vmatpush3.bf16.msra.mxu0 %v4233_v22 }
 0x27e   :  { %3852 = vmatprep.subr.bf16.mxu0 %v4235_v26 }
 0x281   :  { %3853 = vmatpush3.bf16.msra.mxu0 %v4237_v28 }
 0x282   :  { %3854 = vmatprep.subr.bf16.mxu0 %v4239_v31 }
 0x285   :  { %3855 = vmatpush3.bf16.msra.mxu0 %v4241_v55 }
 0x286   :  { %3856 = vmatprep.subr.bf16.mxu0 %v4243_v36 }
 0x289   :  { %3857 = vmatpush3.bf16.msra.mxu0 %v4245_v38 }
 0x28a   :  { %3858 = vmatprep.subr.bf16.mxu0 %v4247_v40 }
 0x28d   :  { %3859 = vmatpush3.bf16.msra.mxu0 %v4249_v42 }
 0x28e   :  { %3860 = vmatprep.subr.bf16.mxu0 %v4251_v45 }
 0x291   :  { %3861 = vmatpush3.bf16.msra.mxu0 %v4253_v48 }
 0x292   :  { %3862 = vmatprep.subr.bf16.mxu0 %v4255_v4 }
 0x295   :  { %3863 = vmatpush3.bf16.msra.mxu0 %v4257_v32 }
 0x296   :  { %3904 = vmatprep.subr.bf16.mxu0 %v4259_v57 }
 0x30a   :  { %v3714_v58 = vpop.f32.mrb[32].mxu0  ;;  %v3742_v59 = vpop.f32.mrb[20].mxu1 }
 0x30b   :  { %v3715_v60 = vpop.f32.mrb[33].mxu0  ;;  %v3743_v63 = vpop.f32.mrb[21].mxu1 }
 0x30c   :  { %v3716_v52 = vadd.f32 %v3715_v60, %v3714_v58  ;;  %v3744_v0 = vadd.f32 %v3743_v63, %v3742_v59  ;;  %v3717_v1 = vpop.f32.mrb[34].mxu0  ;;  %v3745_v2 = vpop.f32.mrb[22].mxu1 }
 0x30d   :  { %v3718_v3 = vpop.f32.mrb[35].mxu0  ;;  %v3746_v5 = vpop.f32.mrb[23].mxu1 }
 0x30e   :  { %v1965_v51 = vadd.f32 %v3716_v52, %v3369_v54  ;;  %v3719_v6 = vadd.f32 %v3718_v3, %v3717_v1  ;;  %v3747_v9 = vadd.f32 %v3746_v5, %v3745_v2 }
 0x310   :  { %v2014_v7 = vadd.f32 %v3744_v0, %v1965_v51  ;;  %v1968_v8 = vadd.f32 %v3719_v6, %v3369_v54 }
 0x312   :  { %v2017_v12 = vadd.f32 %v3747_v9, %v1968_v8  ;;  %v3720_v14 = vpop.f32.mrb[36].mxu0  ;;  %v3748_v16 = vpop.f32.mrb[24].mxu1 }
 0x313   :  { %v3721_v17 = vpop.f32.mrb[37].mxu0  ;;  %v3749_v53 = vpop.f32.mrb[25].mxu1 }
 0x314   :  { %v3722_v19 = vadd.f32 %v3721_v17, %v3720_v14  ;;  %v3750_v20 = vadd.f32 %v3749_v53, %v3748_v16  ;;  %v3723_v21 = vpop.f32.mrb[38].mxu0  ;;  %v3751_v22 = vpop.f32.mrb[26].mxu1 }
 0x315   :  { %v3724_v25 = vpop.f32.mrb[39].mxu0  ;;  %v3752_v26 = vpop.f32.mrb[27].mxu1 }
 0x316   :  { %v1973_v27 = vadd.f32 %v3722_v19, %v3369_v54  ;;  %v3725_v28 = vadd.f32 %v3724_v25, %v3723_v21  ;;  %v3753_v29 = vadd.f32 %v3752_v26, %v3751_v22 }
 0x318   :  { %v2022_v31 = vadd.f32 %v3750_v20, %v1973_v27  ;;  %v1976_v33 = vadd.f32 %v3725_v28, %v3369_v54 }
 0x31a   :  { %v2025_v55 = vadd.f32 %v3753_v29, %v1976_v33 }
 0x32a   :  { %v3770_v35 = vpop.f32.mrb[40].mxu0  ;;  %v3798_v36 = vpop.f32.mrb[28].mxu1 }
 0x32b   :  { %v3771_v37 = vpop.f32.mrb[41].mxu0  ;;  %v3799_v38 = vpop.f32.mrb[29].mxu1 }
 0x32c   :  { %v3772_v39 = vadd.f32 %v3771_v37, %v3770_v35  ;;  %v3800_v40 = vadd.f32 %v3799_v38, %v3798_v36  ;;  %v3773_v41 = vpop.f32.mrb[42].mxu0  ;;  %v3801_v42 = vpop.f32.mrb[30].mxu1 }
 0x32d   :  { %v3774_v44 = vpop.f32.mrb[43].mxu0  ;;  %v3802_v45 = vpop.f32.mrb[31].mxu1 }
 0x32e   :  { %v2063_v46 = vadd.f32 %v3772_v39, %v2014_v7  ;;  %v3775_v48 = vadd.f32 %v3774_v44, %v3773_v41  ;;  %v3803_v49 = vadd.f32 %v3802_v45, %v3801_v42 }
 0x330   :  { %v2066_v4 = vadd.f32 %v3775_v48, %v2017_v12  ;;  %v2112_v50 = vadd.f32 %v3800_v40, %v2063_v46 }
 0x332   :  { %v3776_v32 = vpop.f32.mrb[44].mxu0  ;;  %v3804_v56 = vpop.f32.mrb[32].mxu1  ;;  %v2115_v57 = vadd.f32 %v3803_v49, %v2066_v4 }
 0x333   :  { %v3777_v58 = vpop.f32.mrb[45].mxu0  ;;  %v3805_v59 = vpop.f32.mrb[33].mxu1 }
 0x334   :  { %v3778_v54 = vadd.f32 %v3777_v58, %v3776_v32  ;;  %v3806_v60 = vadd.f32 %v3805_v59, %v3804_v56  ;;  %v3779_v63 = vpop.f32.mrb[46].mxu0  ;;  %v3807_v52 = vpop.f32.mrb[34].mxu1  ;;  %v4260_v32 = vld [vmem:[%s5447_s7 + $0x100] sm:$0xff]  }
 0x335   :  { %v3780_v0 = vpop.f32.mrb[47].mxu0  ;;  %v3808_v1 = vpop.f32.mrb[35].mxu1  ;;  %v4261_v56 = vld [vmem:[%s5447_s7 + $0x180] sm:$0xff]  }
 0x336   :  { %v2071_v2 = vadd.f32 %v3778_v54, %v2022_v31  ;;  %v3781_v3 = vadd.f32 %v3780_v0, %v3779_v63  ;;  %v3809_v5 = vadd.f32 %v3808_v1, %v3807_v52  ;;  %v4262_v54 = vld [vmem:[%s5447_s7 + $0x148] sm:$0xff]  }
 0x337   :  { %v4264_v1 = vld [vmem:[%s5447_s7 + $0x108] sm:$0xff]  }
 0x338   :  { %v2074_v51 = vadd.f32 %v3781_v3, %v2025_v55  ;;  %v2120_v6 = vadd.f32 %v3806_v60, %v2071_v2  ;;  %v4263_v60 = vld [vmem:[%s5447_s7 + $0x1c8] sm:$0xff]  }
 0x339   :  { %v4265_v2 = vld [vmem:[%s5447_s7 + $0x188] sm:$0xff]  }
 0x33a   :  { %v2123_v9 = vadd.f32 %v3809_v5, %v2074_v51  ;;  %v4266_v5 = vld [vmem:[%s5447_s7 + $0x150] sm:$0xff]  }
 0x33b   :  { %v4267_v51 = vld [vmem:[%s5447_s7 + $0x1d0] sm:$0xff]  }
 0x34b   :  { %v4021_v7 = vpop.f32.mrb[48].mxu0 }
 0x34c   :  { %v2169_v8 = vadd.f32 %v4021_v7, %v2120_v6  ;;  %v2160_v12 = vpop.f32.mrb[49].mxu0  ;;  %v4269_v7 = vld [vmem:[%s5447_s7 + $0x190] sm:$0xff]  }
 0x34d   :  { %v2161_v14 = vadd.f32 %v2160_v12, %v2112_v50  ;;  %v4022_v16 = vpop.f32.mrb[50].mxu0 }
 0x34e   :  { %v2172_v17 = vadd.f32 %v4022_v16, %v2123_v9  ;;  %v2163_v53 = vpop.f32.mrb[51].mxu0  ;;  %v2177_v20 = vmax.f32 %v2169_v8, 0.0  ;;  %v4270_v16 = vld [vmem:[%s5447_s7 + $0x158] sm:$0xff]  }
 0x34f   :  { %v2164_v19 = vadd.f32 %v2163_v53, %v2115_v57  ;;  %v2175_v22 = vmax.f32 %v2161_v14, 0.0 }
 0x350   :  { %v2178_v21 = vmax.f32 %v2172_v17, 0.0  ;;  %v4271_v17 = vld [vmem:[%s5447_s7 + $0x1d8] sm:$0xff]  }
 0x351   :  { %v2176_v25 = vmax.f32 %v2164_v19, 0.0 }
 0x352   :  { %v5206_v26 = vpack.c.bf16 %v2178_v21, %v2177_v20  ;;  %v4272_v20 = vld [vmem:[%s5447_s7 + $0x118] sm:$0xff]  }
 0x353   :  { %v5208_v27 = vpack.c.bf16 %v2176_v25, %v2175_v22  ;;  %v4273_v21 = vld [vmem:[%s5447_s7 + $0x198] sm:$0xff]   ;;  %v4274_v22 = vld [vmem:[%s5447_s7 + $0x160] sm:$0xff]  }
 0x354   :  { %v2184_v28 = vrot.slane %v5206_v26, 6  ;;  %v2227_v29 = vshrl.u32 %v5206_v26, 16  ;;  %v2230_v42 = vshll.u32 %v5206_v26, 16  ;;  %v4275_v25 = vld [vmem:[%s5447_s7 + $0x1e0] sm:$0xff]  }
 0x355   :  { %v2183_v31 = vrot.slane %v5208_v27, 6  ;;  %v2220_v33 = vshrl.u32 %v5208_v27, 16  ;;  %v2223_v36 = vshll.u32 %v5208_v27, 16  ;;  %v2249_v53 = vrot.slane %v5208_v27, 2 }
 0x356   :  { %v2189_v37 = vsel %vm301_vm8, 0, %v2184_v28  ;;  %v2229_v40 = vrot.slane %v2227_v29, 7 }
 0x357   :  { %v2186_v55 = vsel %vm301_vm8, 0, %v2183_v31  ;;  %3534 = vmatprep.mubr.msk.bf16.mxu1 %vm4582_vm9, %v2183_v31  ;;  %v2222_v35 = vrot.slane %v2220_v33, 7  ;;  %v2197_v46 = vshrl.u32 %v2189_v37, 16  ;;  %v2200_v48 = vshll.u32 %v2189_v37, 16  ;;  %v4277_v31 = vld [vmem:[%s5447_s7 + $0x1a0] sm:$0xff]   ;;  %v4281_v37 = vld [vmem:[%s5447_s7 + $0x1a8] sm:$0xff]  }
 0x358   :  { %v2191_v38 = vshrl.u32 %v2186_v55, 16  ;;  %v2194_v39 = vshll.u32 %v2186_v55, 16  ;;  %v2232_v57 = vor.u32 %v2230_v42, %v2229_v40  ;;  %v2239_v3 = vrot.slane %v2223_v36, 1  ;;  %v4279_v55 = vld [vmem:[%s5447_s7 + $0x1e8] sm:$0xff]  }
 0x359   :  { %v2225_v41 = vor.u32 %v2223_v36, %v2222_v35  ;;  %v2199_v63 = vrot.slane %v2197_v46, 7  ;;  %v2211_v52 = vrot.slane %v2200_v48, 1  ;;  %v2252_v35 = vsel %vm1312_vm2, %v2249_v53, 0  ;;  %v4280_v36 = vld [vmem:[%s5447_s7 + $0x128] sm:$0xff]  }
 0x35a   :  { %v2193_v44 = vrot.slane %v2191_v38, 7  ;;  %v2209_v45 = vrot.slane %v2194_v39, 1  ;;  %v2236_v0 = vsel %vm4565_vm6, 0, %v2232_v57  ;;  %v2240_v8 = vor.u32 %v2239_v3, %v2220_v33  ;;  %v4278_v33 = vld [vmem:[%s5447_s7 + $0x168] sm:$0xff]   ;;  %v4289_v57 = vld [vmem:[%s5447_s7 + $0x1b8] sm:$0xff]  }
 0x35b   :  { %v2235_v49 = vsel %vm4565_vm6, 0, %v2225_v41  ;;  %v2202_v6 = vor.u32 %v2200_v48, %v2199_v63  ;;  %v2212_v9 = vor.u32 %v2211_v52, %v2197_v46  ;;  %v2257_v40 = vshrl.u32 %v2252_v35, 16  ;;  %v4286_v46 = vld [vmem:[%s5447_s7 + $0x178] sm:$0xff]   ;;  %v4291_v63 = vld [vmem:[%s5447_s7 + $0x208] sm:$0xff]  }
 0x35c   :  { %3539 = vmatprep.mubr.msk.bf16.mxu0 %vm4569_vm7, %v2235_v49  ;;  %v2196_v4 = vor.u32 %v2194_v39, %v2193_v44  ;;  %v2210_v50 = vor.u32 %v2209_v45, %v2191_v38  ;;  %v2245_v19 = vsel %vm4931_vm1, %v2240_v8, 0  ;;  %v4282_v38 = vld [vmem:[%s5447_s7 + $0x170] sm:$0xff]   ;;  %v2250_v41 = vrot.slane %v5206_v26, 2  ;;  %v4287_v48 = vld [vmem:[%s5447_s7 + $0x1f8] sm:$0xff]  }
 0x35d   :  { %v2206_v12 = vsel %vm4565_vm6, 0, %v2202_v6  ;;  %v2216_v14 = vsel %vm4931_vm1, %v2212_v9, 0  ;;  %v4283_v39 = vld [vmem:[%s5447_s7 + $0x1f0] sm:$0xff]   ;;  %v2259_v49 = vrot.slane %v2257_v40, 7  ;;  %v4297_v9 = vld [vmem:[%s5447_s7 + $0x238] sm:$0xff]  }
 0x35e   :  { %v2205_v58 = vsel %vm4565_vm6, 0, %v2196_v4  ;;  %v2215_v59 = vsel %vm4931_vm1, %v2210_v50, 0  ;;  %v4284_v44 = vld [vmem:[%s5447_s7 + $0x130] sm:$0xff]   ;;  %v2241_v4 = vrot.slane %v2230_v42, 1  ;;  %v2255_v50 = vsel %vm1312_vm2, %v2250_v41, 0 }
 0x35f   :  { %3535 = vmatmul.mubr.msk.bf16.vlgmr.msra.gmra.mrb[36].mxu1 %vm4569_vm7, %v2205_v58  ;;  %3540 = vmatmul.mubr.msk.bf16.vlgmr.msra.gmra.mrb[52].mxu0 %vm4918_vm0, %v2215_v59  ;;  %v4285_v45 = vld [vmem:[%s5447_s7 + $0x1b0] sm:$0xff]   ;;  %v4290_v58 = vld [vmem:[%s5447_s7 + $0x200] sm:$0xff]   ;;  %v2263_v59 = vshrl.u32 %v2255_v50, 16 }
 0x360   :  { %3877 = vmatpush3.bf16.msra.mxu1 %v4260_v32  ;;  %3905 = vmatpush3.bf16.msra.mxu0 %v4261_v56  ;;  %v2260_v32 = vshll.u32 %v2252_v35, 16  ;;  %v4288_v56 = vld [vmem:[%s5447_s7 + $0x138] sm:$0xff]  }
 0x361   :  { %3537 = vmatprep.mubr.msk.bf16.mxu1 %vm4582_vm9, %v2184_v28  ;;  %3541 = vmatprep.mubr.msk.bf16.mxu0 %vm4569_vm7, %v2236_v0  ;;  %v4276_v28 = vld [vmem:[%s5447_s7 + $0x120] sm:$0xff]   ;;  %v2265_v52 = vrot.slane %v2263_v59, 7 }
 0x362   :  { %3878 = vmatprep.subr.bf16.mxu1 %v4262_v54  ;;  %3906 = vmatprep.subr.bf16.mxu0 %v4263_v60  ;;  %v2262_v42 = vor.u32 %v2260_v32, %v2259_v49  ;;  %v2242_v54 = vor.u32 %v2241_v4, %v2227_v29  ;;  %v2275_v29 = vrot.slane %v2260_v32, 1 }
 0x364   :  { %3879 = vmatpush3.bf16.msra.mxu1 %v4264_v1  ;;  %3907 = vmatpush3.bf16.msra.mxu0 %v4265_v2  ;;  %v2271_v60 = vsel %vm4565_vm6, 0, %v2262_v42  ;;  %v2246_v0 = vsel %vm4931_vm1, %v2242_v54, 0  ;;  %v2266_v1 = vshll.u32 %v2255_v50, 16  ;;  %v2276_v3 = vor.u32 %v2275_v29, %v2257_v40 }
 0x365   :  { %3880 = vmatprep.subr.bf16.mxu1 %v4266_v5  ;;  %3908 = vmatprep.subr.bf16.mxu0 %v4267_v51  ;;  %v4293_v51 = vld [vmem:[%s5447_s7 + $0x218] sm:$0xff]  }
 0x366   :  { %v2268_v2 = vor.u32 %v2266_v1, %v2265_v52  ;;  %v2281_v6 = vsel %vm4931_vm1, %v2276_v3, 0 }
 0x367   :  { %3538 = vmatmul.mubr.msk.bf16.gmra.mrb[40].mxu1 %vm4569_vm7, %v2206_v12  ;;  %3542 = vmatmul.mubr.msk.bf16.gmra.mrb[56].mxu0 %vm4918_vm0, %v2216_v14  ;;  %v4298_v12 = vld [vmem:[%s5449_s9] sm:$0xff]   ;;  %v4307_v14 = vmov 0.0  }
 0x368   :  { %3881 = vmatpush3.bf16.msra.mxu1 %v4268_v34  ;;  %3909 = vmatpush3.bf16.msra.mxu0 %v4269_v7  ;;  %v2272_v5 = vsel %vm4565_vm6, 0, %v2268_v2  ;;  %v2277_v34 = vrot.slane %v2266_v1, 1 }
 0x369   :  { %3543 = vmatprep.mubr.msk.bf16.mxu1 %vm4918_vm0, %v2245_v19  ;;  %3545 = vmatprep.mubr.msk.bf16.mxu0 %vm1312_vm2, %v2249_v53  ;;  %v4303_v53 = vld [vmem:[%s5449_s9 + $0x28] sm:$0xff]   ;;  %v4304_v19 = vld [vmem:[%s5449_s9 + $0x30] sm:$0xff]  }
 0x36a   :  { %3882 = vmatprep.subr.bf16.mxu1 %v4270_v16  ;;  %3910 = vmatprep.subr.bf16.mxu0 %v4271_v17  ;;  %v2278_v7 = vor.u32 %v2277_v34, %v2263_v59  ;;  %v4299_v16 = vld [vmem:[%s5449_s9 + $0x8] sm:$0xff]   ;;  %v4302_v17 = vld [vmem:[%s5449_s9 + $0x20] sm:$0xff]  }
 0x36c   :  { %3883 = vmatpush3.bf16.msra.mxu1 %v4272_v20  ;;  %3911 = vmatpush3.bf16.msra.mxu0 %v4273_v21  ;;  %v2282_v8 = vsel %vm4931_vm1, %v2278_v7, 0  ;;  %v4305_v20 = vld [vmem:[%s5449_s9 + $0x38] sm:$0xff]  }
 0x36d   :  { %3884 = vmatprep.subr.bf16.mxu1 %v4274_v22  ;;  %3912 = vmatprep.subr.bf16.mxu0 %v4275_v25  ;;  %v3460_v25 = vld [vmem:[%s5450_s8] ss:$0 sm:$0xff] }
 0x370   :  { %3885 = vmatpush3.bf16.msra.mxu1 %v4276_v28  ;;  %3913 = vmatpush3.bf16.msra.mxu0 %v4277_v31 }
 0x371   :  { %3886 = vmatprep.subr.bf16.mxu1 %v4278_v33  ;;  %3914 = vmatprep.subr.bf16.mxu0 %v4279_v55 }
 0x374   :  { %3887 = vmatpush3.bf16.msra.mxu1 %v4280_v36  ;;  %3915 = vmatpush3.bf16.msra.mxu0 %v4281_v37 }
 0x375   :  { %3888 = vmatprep.subr.bf16.mxu1 %v4282_v38  ;;  %3916 = vmatprep.subr.bf16.mxu0 %v4283_v39 }
 0x378   :  { %3889 = vmatpush3.bf16.msra.mxu1 %v4284_v44  ;;  %3917 = vmatpush3.bf16.msra.mxu0 %v4285_v45 }
 0x379   :  { %3890 = vmatprep.subr.bf16.mxu1 %v4286_v46  ;;  %3918 = vmatprep.subr.bf16.mxu0 %v4287_v48 }
 0x37c   :  { %3891 = vmatpush3.bf16.msra.mxu1 %v4288_v56  ;;  %3919 = vmatpush3.bf16.msra.mxu0 %v4289_v57 }
 0x37d   :  { %4023 = vmatprep.subr.bf16.mxu1 %v4290_v58  ;;  %4043 = vmatprep.subr.bf16.mxu0 %v4307_v14 }
 0x37f   :  { %2999 = vmatmul.mubr.bf16.vlgmr.msra.gmra.mrb[44].mxu1 %v5208_v27  ;;  %3546 = vmatmul.mubr.msk.bf16.vlgmr.msra.gmra.mrb[60].mxu0 %vm4569_vm7, %v2271_v60  ;;  %v4292_v27 = vld [vmem:[%s5447_s7 + $0x210] sm:$0xff]  }
 0x380   :  { %3544 = vmatprep.mubr.msk.bf16.mxu1 %vm4918_vm0, %v2246_v0  ;;  %3547 = vmatprep.mubr.msk.bf16.mxu0 %vm1312_vm2, %v2250_v41 }
 0x381   :  { %4024 = vmatpush3.bf16.msra.mxu1 %v4290_v58  ;;  %4044 = vmatpush3.bf16.msra.mxu0 %v4298_v12 }
 0x382   :  { %4025 = vmatprep.subr.bf16.mxu1 %v4291_v63  ;;  %4045 = vmatprep.subr.bf16.mxu0 %v4307_v14 }
 0x385   :  { %4026 = vmatpush3.bf16.msra.mxu1 %v4291_v63  ;;  %4046 = vmatpush3.bf16.msra.mxu0 %v4299_v16 }
 0x386   :  { %4027 = vmatprep.subr.bf16.mxu1 %v4292_v27  ;;  %4047 = vmatprep.subr.bf16.mxu0 %v4307_v14 }
 0x387   :  { %3007 = vmatmul.mubr.bf16.gmra.mrb[48].mxu1 %v5206_v26  ;;  %3548 = vmatmul.mubr.msk.bf16.gmra.mrb[64].mxu0 %vm4569_vm7, %v2272_v5  ;;  %v4295_v26 = vld [vmem:[%s5447_s7 + $0x228] sm:$0xff]  }
 0x388   :  { %4039 = vmatprep.mubr.msk.bf16.mxu1 %vm4918_vm0, %v2281_v6  ;;  %4059 = vmatprep.mubr.msk.bf16.mxu0 %vm4308_vm3, %v4307_v14 }
 0x389   :  { %4028 = vmatpush3.bf16.msra.mxu1 %v4292_v27  ;;  %4048 = vmatpush3.bf16.msra.mxu0 %v4300_v47 }
 0x38a   :  { %4029 = vmatprep.subr.bf16.mxu1 %v4293_v51  ;;  %4049 = vmatprep.subr.bf16.mxu0 %v4307_v14 }
 0x38d   :  { %4030 = vmatpush3.bf16.msra.mxu1 %v4293_v51  ;;  %4050 = vmatpush3.bf16.msra.mxu0 %v4301_v43 }
 0x38e   :  { %4031 = vmatprep.subr.bf16.mxu1 %v4294_v23  ;;  %4051 = vmatprep.subr.bf16.mxu0 %v4307_v14 }
 0x391   :  { %4032 = vmatpush3.bf16.msra.mxu1 %v4294_v23  ;;  %4052 = vmatpush3.bf16.msra.mxu0 %v4302_v17 }
 0x392   :  { %4033 = vmatprep.subr.bf16.mxu1 %v4295_v26  ;;  %4053 = vmatprep.subr.bf16.mxu0 %v4307_v14 }
 0x395   :  { %4034 = vmatpush3.bf16.msra.mxu1 %v4295_v26  ;;  %4054 = vmatpush3.bf16.msra.mxu0 %v4303_v53 }
 0x396   :  { %4035 = vmatprep.subr.bf16.mxu1 %v4296_v24  ;;  %4055 = vmatprep.subr.bf16.mxu0 %v4307_v14 }
 0x399   :  { %4036 = vmatpush3.bf16.msra.mxu1 %v4296_v24  ;;  %4056 = vmatpush3.bf16.msra.mxu0 %v4304_v19 }
 0x39a   :  { %4037 = vmatprep.subr.bf16.mxu1 %v4297_v9  ;;  %4057 = vmatprep.subr.bf16.mxu0 %v4307_v14 }
 0x39d   :  { %4038 = vmatpush3.bf16.msra.mxu1 %v4297_v9  ;;  %4058 = vmatpush3.bf16.msra.mxu0 %v4305_v20 }
 0x3a0   :  { %4040 = vmatmul.mubr.msk.bf16.vlgmr.msra.gmra.mrb[52].mxu1 %vm4918_vm0, %v2282_v8 }
 0x432   :  { %v3836_v21 = vpop.f32.mrb[36].mxu1  ;;  %v3864_v22 = vpop.f32.mrb[52].mxu0 }
 0x433   :  { %v3837_v28 = vpop.f32.mrb[37].mxu1  ;;  %v3865_v31 = vpop.f32.mrb[53].mxu0 }
 0x434   :  { %v3838_v33 = vadd.f32 %v3837_v28, %v3836_v21  ;;  %v3866_v55 = vadd.f32 %v3865_v31, %v3864_v22  ;;  %v3839_v35 = vpop.f32.mrb[38].mxu1  ;;  %v3867_v36 = vpop.f32.mrb[54].mxu0 }
 0x435   :  { %v3840_v37 = vpop.f32.mrb[39].mxu1  ;;  %v3868_v38 = vpop.f32.mrb[55].mxu0 }
 0x436   :  { %v2903_v39 = vadd.f32 %v3838_v33, %v3460_v25  ;;  %v3841_v40 = vadd.f32 %v3840_v37, %v3839_v35  ;;  %v3869_v41 = vadd.f32 %v3868_v38, %v3867_v36 }
 0x438   :  { %v2952_v44 = vadd.f32 %v3866_v55, %v2903_v39  ;;  %v2906_v45 = vadd.f32 %v3841_v40, %v3460_v25 }
 0x43a   :  { %v2955_v46 = vadd.f32 %v3869_v41, %v2906_v45  ;;  %v3842_v48 = vpop.f32.mrb[40].mxu1  ;;  %v3870_v49 = vpop.f32.mrb[56].mxu0 }
 0x43b   :  { %v3843_v4 = vpop.f32.mrb[41].mxu1  ;;  %v3871_v50 = vpop.f32.mrb[57].mxu0 }
 0x43c   :  { %v3844_v32 = vadd.f32 %v3843_v4, %v3842_v48  ;;  %v3872_v56 = vadd.f32 %v3871_v50, %v3870_v49  ;;  %v3845_v57 = vpop.f32.mrb[42].mxu1  ;;  %v3873_v58 = vpop.f32.mrb[58].mxu0 }
 0x43d   :  { %v3846_v42 = vpop.f32.mrb[43].mxu1  ;;  %v3874_v59 = vpop.f32.mrb[59].mxu0 }
 0x43e   :  { %v2911_v54 = vadd.f32 %v3844_v32, %v3460_v25  ;;  %v3847_v60 = vadd.f32 %v3846_v42, %v3845_v57  ;;  %v3875_v63 = vadd.f32 %v3874_v59, %v3873_v58 }
 0x440   :  { %v2960_v52 = vadd.f32 %v3872_v56, %v2911_v54  ;;  %v2914_v0 = vadd.f32 %v3847_v60, %v3460_v25 }
 0x442   :  { %v2963_v29 = vadd.f32 %v3875_v63, %v2914_v0 }
 0x452   :  { %v3892_v1 = vpop.f32.mrb[44].mxu1  ;;  %v3920_v2 = vpop.f32.mrb[60].mxu0 }
 0x453   :  { %v3893_v27 = vpop.f32.mrb[45].mxu1  ;;  %v3921_v3 = vpop.f32.mrb[61].mxu0 }
 0x454   :  { %v3894_v5 = vadd.f32 %v3893_v27, %v3892_v1  ;;  %v3922_v51 = vadd.f32 %v3921_v3, %v3920_v2  ;;  %v3895_v6 = vpop.f32.mrb[46].mxu1  ;;  %v3923_v23 = vpop.f32.mrb[62].mxu0 }
 0x455   :  { %v3896_v26 = vpop.f32.mrb[47].mxu1  ;;  %v3924_v24 = vpop.f32.mrb[63].mxu0 }
 0x456   :  { %v3001_v9 = vadd.f32 %v3894_v5, %v2952_v44  ;;  %v3897_v34 = vadd.f32 %v3896_v26, %v3895_v6  ;;  %v3925_v7 = vadd.f32 %v3924_v24, %v3923_v23  ;;  %v3551_v6 = vld [vmem:[%s5451_s10] ss:$0 sm:$0xff] }
 0x458   :  { %v3004_v8 = vadd.f32 %v3897_v34, %v2955_v46  ;;  %v3050_v12 = vadd.f32 %v3922_v51, %v3001_v9 }
 0x45a   :  { %v3898_v14 = vpop.f32.mrb[48].mxu1  ;;  %v3926_v16 = vpop.f32.mrb[64].mxu0  ;;  %v3053_v47 = vadd.f32 %v3925_v7, %v3004_v8 }
 0x45b   :  { %v3899_v43 = vpop.f32.mrb[49].mxu1  ;;  %v3927_v17 = vpop.f32.mrb[65].mxu0 }
 0x45c   :  { %v3900_v53 = vadd.f32 %v3899_v43, %v3898_v14  ;;  %v3928_v19 = vadd.f32 %v3927_v17, %v3926_v16  ;;  %v3901_v20 = vpop.f32.mrb[50].mxu1  ;;  %v3929_v21 = vpop.f32.mrb[66].mxu0 }
 0x45d   :  { %v3902_v22 = vpop.f32.mrb[51].mxu1  ;;  %v3930_v25 = vpop.f32.mrb[67].mxu0 }
 0x45e   :  { %v3009_v28 = vadd.f32 %v3900_v53, %v2960_v52  ;;  %v3903_v31 = vadd.f32 %v3902_v22, %v3901_v20  ;;  %v3931_v33 = vadd.f32 %v3930_v25, %v3929_v21 }
 0x460   :  { %v3012_v55 = vadd.f32 %v3903_v31, %v2963_v29  ;;  %v3058_v35 = vadd.f32 %v3928_v19, %v3009_v28 }
 0x462   :  { %v3061_v36 = vadd.f32 %v3931_v33, %v3012_v55 }
 0x473   :  { %v4041_v37 = vpop.f32.mrb[52].mxu1 }
 0x474   :  { %v3107_v38 = vadd.f32 %v4041_v37, %v3058_v35  ;;  %v3098_v39 = vpop.f32.mrb[53].mxu1 }
 0x475   :  { %v3099_v40 = vadd.f32 %v3098_v39, %v3050_v12  ;;  %v4042_v41 = vpop.f32.mrb[54].mxu1 }
 0x476   :  { %v3115_v44 = vadd.f32 %v3107_v38, %v1225_v10  ;;  %v3110_v45 = vadd.f32 %v4042_v41, %v3061_v36  ;;  %v3101_v46 = vpop.f32.mrb[55].mxu1 }
 0x477   :  { %v3113_v48 = vadd.f32 %v3099_v40, %v1223_v62  ;;  %v3102_v49 = vadd.f32 %v3101_v46, %v3053_v47 }
 0x478   :  { %v3116_v4 = vadd.f32 %v3110_v45, %v1226_v61  ;;  %v3119_v32 = vmax.f32 %v3115_v44, 0.0 }
 0x479   :  { %v3114_v50 = vadd.f32 %v3102_v49, %v1224_v30  ;;  %v3117_v57 = vmax.f32 %v3113_v48, 0.0 }
 0x47a   :  { %v3120_v56 = vmax.f32 %v3116_v4, 0.0 }
 0x47b   :  { %v3118_v58 = vmax.f32 %v3114_v50, 0.0 }
 0x47c   :  { %v3128_v42 = vadd.f32 %v3120_v56, %v3119_v32 }
 0x47d   :  { %v3121_v59 = vadd.f32 %v3118_v58, %v3117_v57 }
 0x47e   :  { %v3129_v11 = vrot.slane %v3128_v42, 4 }
 0x47f   :  { %v3122_v10 = vrot.slane %v3121_v59, 4 }
 0x480   :  { %v3130_v54 = vadd.f32 %v3129_v11, %v3128_v42 }
 0x481   :  { %v3123_v60 = vadd.f32 %v3122_v10, %v3121_v59 }
 0x482   :  { %v3131_v63 = vrot.slane %v3130_v54, 2 }
 0x483   :  { %v3124_v13 = vrot.slane %v3123_v60, 2 }
 0x484   :  { %v3132_v62 = vadd.f32 %v3131_v63, %v3130_v54 }
 0x485   :  { %v3125_v52 = vadd.f32 %v3124_v13, %v3123_v60 }
 0x486   :  { %v3133_v0 = vrot.slane %v3132_v62, 1 }
 0x487   :  { %v3126_v15 = vrot.slane %v3125_v52, 1 }
 0x488   :  { %v3134_v61 = vadd.f32 %v3133_v0, %v3132_v62 }
 0x489   :  { %v3127_v29 = vadd.f32 %v3126_v15, %v3125_v52 }
 0x48a   :  { %v3136_v18 = vmul.f32 0.0625, %v3134_v61 }
 0x48b   :  { %v3135_v30 = vmul.f32 0.0625, %v3127_v29 }
 0x48c   :  { %v3138_v1 = vpack.c.bf16 %v3136_v18, %v3136_v18 }
 0x48d   :  { %v3137_v2 = vpack.c.bf16 %v3135_v30, %v3135_v30 }
 0x48e   :  { %v3165_v27 = vunpack.c.l.b16 %v3138_v1 }
 0x48f   :  { %v3164_v3 = vunpack.c.l.b16 %v3137_v2 }
 0x491   :  { %v3167_v5 = vsel %vm3166_vm4, %v3165_v27, %v3164_v3 }
 0x492   :  { %v3168_v51 = vpack.c.b16 %v3167_v5, %v3167_v5 }
 0x494   :  { %4060 = vmatmul.mubr.bf16.vlgmr.msra.gmra.mrb[68].mxu0 %v3168_v51 }
 0x567   :  { %v3252_v23 = vpop.f32.mrb[68].mxu0 }
 0x568   :  { %v3253_v26 = vadd.f32 %v3551_v6, %v3252_v23  ;;  %v4061_v24 = vpop.f32.mrb[69].mxu0 }
 0x569   :  { %v3255_v9 = vpop.f32.mrb[70].mxu0 }
 0x56a   :  { %3258 = vst [vmem:[%s5452_s11] sm:$0x3] %v3253_v26  ;;  %v4062_v34 = vpop.f32.mrb[71].mxu0 }

</bundles_post_ra>
